<compile_context>
chip_gen: v5e
topology: v5e:2x2
jax: 0.10.0
libtpu: 0.0.40
codegen_flags: <defaults>
</compile_context>

<pallas_src>
import functools
import math

import jax
import jax.numpy as jnp
from jax import lax
from jax.experimental import pallas as pl
from jax.experimental.pallas import tpu as pltpu


# ----------------------------- in-kernel helpers -----------------------------

def _mm(a, b, mat_dtype):
    """MXU matmul: operands cast to mat_dtype, accumulation in f32."""
    return jnp.dot(a.astype(mat_dtype), b.astype(mat_dtype),
                   preferred_element_type=jnp.float32)


def _layernorm_2d(h, eps=1e-5):
    # Fresh torch.nn.LayerNorm((T, dmodel)): weight=1, bias=0, biased variance,
    # normalization over the whole (T, dmodel) slab of one batch element.
    mu = jnp.mean(h)
    var = jnp.mean(jnp.square(h - mu))
    return (h - mu) * lax.rsqrt(var + eps)


def _mha(q, k, v, wq, wk, wv, wo, *, n_heads, dk, dv, masked, mat_dtype):
    """Multi-head attention for one batch element.

    q: (Tq, D);  k, v: (Tk, D)
    wq, wk: (D, H*dk) head-major fused;  wv: (D, H*dv);  wo: (H*dv, D)
    """
    tq = q.shape[0]
    tk = k.shape[0]
    inv_sqrt_dk = 1.0 / math.sqrt(dk)

    # Fused projections: one full-width MXU matmul each.
    qp = _mm(q, wq, mat_dtype)                               # (Tq, H*dk)
    kp = _mm(k, wk, mat_dtype)                               # (Tk, H*dk)
    vp = _mm(v, wv, mat_dtype)                               # (Tk, H*dv)

    if masked:
        row = lax.broadcasted_iota(jnp.int32, (tq, tk), 0)   # query index
        col = lax.broadcasted_iota(jnp.int32, (tq, tk), 1)   # key index
        keep = col <= row                                    # causal (tril)

    # Per-head scores / softmax / value gather (static unroll; the score
    # matmuls are inherently per-head).  NOTE: at realistic sequence lengths
    # the (Tq, Tk) tile should be streamed (softmax over the query axis
    # accumulated over Tq tiles) instead of fully materialized.
    head_outs = []
    for h in range(n_heads):
        qh = qp[:, h * dk:(h + 1) * dk]                      # (Tq, dk)
        kh = kp[:, h * dk:(h + 1) * dk]                      # (Tk, dk)
        vh = vp[:, h * dv:(h + 1) * dv]                      # (Tk, dv)
        s = _mm(qh, kh.T, mat_dtype) * inv_sqrt_dk           # (Tq, Tk)  f32
        if masked:
            s = jnp.where(keep, s, -1e30)
        # Reference: torch.softmax(heads, 2) over (B, H, Tq, Tk) -> the QUERY
        # axis, which here is axis 0.  EUP approx reciprocal for the norm.
        m = jnp.max(s, axis=0, keepdims=True)
        e = jnp.exp(s - m)
        p = e * pl.reciprocal(jnp.sum(e, axis=0, keepdims=True), approx=True)
        head_outs.append(_mm(p, vh, mat_dtype))              # (Tq, dv)

    # permute(0,2,1,3).view(B, Tq, H*dv) @ Wo  ==  concat-heads @ Wo
    concat = jnp.concatenate(head_outs, axis=1)              # (Tq, H*dv)
    return _mm(concat, wo, mat_dtype)                        # (Tq, D)


# --------------------------------- kernel ------------------------------------

def decoder_stack_kernel(x_ref, y_ref,
                         wq1_ref, wk1_ref, wv1_ref, wo1_ref,
                         wq2_ref, wk2_ref, wv2_ref, wo2_ref,
                         win_ref, bin_ref, wout_ref, bout_ref,
                         out_ref, *, n_heads, dk, dv, mat_dtype):
    bb, T, D = x_ref.shape

    # Weight tiles are grid-invariant (index_map -> 0), so they stay resident
    # in VMEM across all grid steps; load once per step, reuse per element.
    wq1 = wq1_ref[...]; wk1 = wk1_ref[...]; wv1 = wv1_ref[...]; wo1 = wo1_ref[...]
    wq2 = wq2_ref[...]; wk2 = wk2_ref[...]; wv2 = wv2_ref[...]; wo2 = wo2_ref[...]
    win = win_ref[...]; b_in = bin_ref[...]
    wout = wout_ref[...]; b_out = bout_ref[...]

    for b in range(bb):                                      # static unroll
        x = x_ref[b]                                         # (T, D)
        y = y_ref[b]                                         # (T, D)

        # masked self-attention on y
        att1 = _mha(y, y, y, wq1, wk1, wv1, wo1,
                    n_heads=n_heads, dk=dk, dv=dv, masked=True,
                    mat_dtype=mat_dtype)
        out1 = _layernorm_2d(att1 + y)

        # cross attention: Q = out1, K = V = x
        att2 = _mha(out1, x, x, wq2, wk2, wv2, wo2,
                    n_heads=n_heads, dk=dk, dv=dv, masked=False,
                    mat_dtype=mat_dtype)
        out2 = _layernorm_2d(att2 + out1)

        # feed-forward: Linear -> ReLU -> Linear (bias adds stay f32)
        inner = jnp.maximum(_mm(out2, win, mat_dtype) + b_in, 0.0)
        ff = _mm(inner, wout, mat_dtype) + b_out

        out_ref[b] = _layernorm_2d(ff + out2).astype(out_ref.dtype)


# -------------------------------- wrapper ------------------------------------

def decoder_stack_forward(x, y, params, *, matmul_dtype=jnp.float32):
    B, T, D = x.shape
    H, _, dk = params['wq1'].shape
    dv = params['wv1'].shape[-1]
    F = params['w_in'].shape[-1]
    assert H * dv == D, "N_heads * dv must equal dmodel (as in the reference)"

    # Host-side glue (free layout plumbing):
    #  * fuse per-head projection weights head-major: (H, D, c) -> (D, H*c)
    #    so column block h*c:(h+1)*c equals W[h]
    #  * keep Wo as the original 2-D (H*dv, D) matrix (concat-heads matmul)
    #  * biases as 2-D rows
    def fuse(w):
        Hh, Dd, c = w.shape
        return jnp.transpose(w, (1, 0, 2)).reshape(Dd, Hh * c)

    cast = lambda w: w.astype(matmul_dtype)
    wq1, wk1, wv1 = cast(fuse(params['wq1'])), cast(fuse(params['wk1'])), cast(fuse(params['wv1']))
    wq2, wk2, wv2 = cast(fuse(params['wq2'])), cast(fuse(params['wk2'])), cast(fuse(params['wv2']))
    wo1, wo2 = cast(params['wo1']), cast(params['wo2'])
    w_in, w_out = cast(params['w_in']), cast(params['w_out'])
    b_in = params['b_in'].reshape(1, F)
    b_out = params['b_out'].reshape(1, D)

    # Batch blocking: 2 parallel grid steps when B is even (v7x: one batch
    # half per TensorCore); otherwise a single step over the whole batch.
    n_blocks = 2 if (B % 2 == 0 and B >= 2) else 1
    bb = B // n_blocks

    in_specs = [
        pl.BlockSpec((bb, T, D), lambda i: (i, 0, 0)),       # x
        pl.BlockSpec((bb, T, D), lambda i: (i, 0, 0)),       # y
        pl.BlockSpec((D, H * dk), lambda i: (0, 0)),         # Wq1 (fused)
        pl.BlockSpec((D, H * dk), lambda i: (0, 0)),         # Wk1 (fused)
        pl.BlockSpec((D, H * dv), lambda i: (0, 0)),         # Wv1 (fused)
        pl.BlockSpec((D, D), lambda i: (0, 0)),              # Wo1
        pl.BlockSpec((D, H * dk), lambda i: (0, 0)),         # Wq2 (fused)
        pl.BlockSpec((D, H * dk), lambda i: (0, 0)),         # Wk2 (fused)
        pl.BlockSpec((D, H * dv), lambda i: (0, 0)),         # Wv2 (fused)
        pl.BlockSpec((D, D), lambda i: (0, 0)),              # Wo2
        pl.BlockSpec((D, F), lambda i: (0, 0)),              # FF W_in
        pl.BlockSpec((1, F), lambda i: (0, 0)),              # FF b_in
        pl.BlockSpec((F, D), lambda i: (0, 0)),              # FF W_out
        pl.BlockSpec((1, D), lambda i: (0, 0)),              # FF b_out
    ]
    out_spec = pl.BlockSpec((bb, T, D), lambda i: (i, 0, 0))

    kernel = functools.partial(decoder_stack_kernel,
                               n_heads=H, dk=dk, dv=dv, mat_dtype=matmul_dtype)
    transformed_skip = pl.pallas_call(
        kernel,
        out_shape=jax.ShapeDtypeStruct((B, T, D), jnp.float32),
        grid=(n_blocks,),
        in_specs=in_specs,
        out_specs=out_spec,
        compiler_params=pltpu.CompilerParams(
            dimension_semantics=("parallel",)),
    )(x, y, wq1, wk1, wv1, wo1, wq2, wk2, wv2, wo2, w_in, b_in, w_out, b_out)

    # The reference returns (x, transformed_skip); x passes through unchanged.
    return x, transformed_skip


# -------------------------- deterministic parameters --------------------------

def init_params(key, n_heads, dk, dv, dmodel, ff_inner_dim):
    ks = jax.random.split(key, 12)
    u = lambda k, shape, lo, hi: jax.random.uniform(k, shape, jnp.float32, lo, hi)
    b_in = 1.0 / math.sqrt(dmodel)       # ~ torch Linear default scale
    b_out = 1.0 / math.sqrt(ff_inner_dim)
    return dict(
        # attention weights: Tensor.uniform_(-1, 1) in the reference
        wq1=u(ks[0], (n_heads, dmodel, dk), -1.0, 1.0),
        wk1=u(ks[1], (n_heads, dmodel, dk), -1.0, 1.0),
        wv1=u(ks[2], (n_heads, dmodel, dv), -1.0, 1.0),
        wo1=u(ks[3], (dmodel, dmodel), -1.0, 1.0),
        wq2=u(ks[4], (n_heads, dmodel, dk), -1.0, 1.0),
        wk2=u(ks[5], (n_heads, dmodel, dk), -1.0, 1.0),
        wv2=u(ks[6], (n_heads, dmodel, dv), -1.0, 1.0),
        wo2=u(ks[7], (dmodel, dmodel), -1.0, 1.0),
        # feed-forward Linear layers (stored as (in, out); y = x @ W + b)
        w_in=u(ks[8], (dmodel, ff_inner_dim), -b_in, b_in),
        b_in=u(ks[9], (ff_inner_dim,), -b_in, b_in),
        w_out=u(ks[10], (ff_inner_dim, dmodel), -b_out, b_out),
        b_out=u(ks[11], (dmodel,), -b_out, b_out),
    )


if __name__ == "__main__":
    # dmodel=128 keeps every activation/output tile lane-dense (last dim 128)
    # while the problem size stays tiny (2 x 8 x 128).  N_heads * dv == dmodel.
    B, T = 2, 8
    N_heads, dk, dv, dmodel, ff_inner = 4, 32, 32, 128, 256

    key = jax.random.PRNGKey(0)
    kx, ky, kp = jax.random.split(key, 3)
    x = jax.random.normal(kx, (B, T, dmodel), jnp.float32)
    y = jax.random.normal(ky, (B, T, dmodel), jnp.float32)
    params = init_params(kp, N_heads, dk, dv, dmodel, ff_inner)

    # On v6e/v7x at realistic sizes, pass matmul_dtype=jnp.bfloat16 (softmax /
    # LayerNorm stay f32 inside the kernel); default f32 keeps toy numerics exact.
    x_out, skip = decoder_stack_forward(x, y, params)
    jax.block_until_ready(skip)
    assert x_out.shape == (B, T, dmodel) and skip.shape == (B, T, dmodel)
    print("KERNEL_OK")
</pallas_src>

<mosaic_0001>
module attributes {stable_mosaic.version = 11 : i64} {
  func.func @decoder_stack_kernel(%arg0: i32, %arg1: memref<1x8x128xf32, #tpu.memory_space<vmem>>, %arg2: memref<1x8x128xf32, #tpu.memory_space<vmem>>, %arg3: memref<128x128xf32, #tpu.memory_space<vmem>>, %arg4: memref<128x128xf32, #tpu.memory_space<vmem>>, %arg5: memref<128x128xf32, #tpu.memory_space<vmem>>, %arg6: memref<128x128xf32, #tpu.memory_space<vmem>>, %arg7: memref<128x128xf32, #tpu.memory_space<vmem>>, %arg8: memref<128x128xf32, #tpu.memory_space<vmem>>, %arg9: memref<128x128xf32, #tpu.memory_space<vmem>>, %arg10: memref<128x128xf32, #tpu.memory_space<vmem>>, %arg11: memref<128x256xf32, #tpu.memory_space<vmem>>, %arg12: memref<1x256xf32, #tpu.memory_space<vmem>>, %arg13: memref<256x128xf32, #tpu.memory_space<vmem>>, %arg14: memref<1x128xf32, #tpu.memory_space<vmem>>, %arg15: memref<1x8x128xf32, #tpu.memory_space<vmem>>) attributes {dimension_semantics = [#tpu.dimension_semantics<parallel>], iteration_bounds = array<i64: 2>, scalar_prefetch = 0 : i64, scratch_operands = 0 : i64, tpu.core_type = #tpu.core_type<tc>, window_params = [{transform_indices = @transform_0, window_bounds = array<i64: 1, 8, 128>}, {transform_indices = @transform_1, window_bounds = array<i64: 1, 8, 128>}, {pipeline_mode = #tpu.pipeline_mode<synchronous>, transform_indices = @transform_2, window_bounds = array<i64: 128, 128>}, {pipeline_mode = #tpu.pipeline_mode<synchronous>, transform_indices = @transform_3, window_bounds = array<i64: 128, 128>}, {pipeline_mode = #tpu.pipeline_mode<synchronous>, transform_indices = @transform_4, window_bounds = array<i64: 128, 128>}, {pipeline_mode = #tpu.pipeline_mode<synchronous>, transform_indices = @transform_5, window_bounds = array<i64: 128, 128>}, {pipeline_mode = #tpu.pipeline_mode<synchronous>, transform_indices = @transform_6, window_bounds = array<i64: 128, 128>}, {pipeline_mode = #tpu.pipeline_mode<synchronous>, transform_indices = @transform_7, window_bounds = array<i64: 128, 128>}, {pipeline_mode = #tpu.pipeline_mode<synchronous>, transform_indices = @transform_8, window_bounds = array<i64: 128, 128>}, {pipeline_mode = #tpu.pipeline_mode<synchronous>, transform_indices = @transform_9, window_bounds = array<i64: 128, 128>}, {pipeline_mode = #tpu.pipeline_mode<synchronous>, transform_indices = @transform_10, window_bounds = array<i64: 128, 256>}, {pipeline_mode = #tpu.pipeline_mode<synchronous>, transform_indices = @transform_11, window_bounds = array<i64: 1, 256>}, {pipeline_mode = #tpu.pipeline_mode<synchronous>, transform_indices = @transform_12, window_bounds = array<i64: 256, 128>}, {pipeline_mode = #tpu.pipeline_mode<synchronous>, transform_indices = @transform_13, window_bounds = array<i64: 1, 128>}, {transform_indices = @transform_14, window_bounds = array<i64: 1, 8, 128>}]} {
    %c0 = arith.constant 0 : index
    %c0_0 = arith.constant 0 : index
    %0 = vector.load %arg3[%c0, %c0_0] : memref<128x128xf32, #tpu.memory_space<vmem>>, vector<128x128xf32>
    %c0_1 = arith.constant 0 : index
    %c0_2 = arith.constant 0 : index
    %1 = vector.load %arg4[%c0_1, %c0_2] : memref<128x128xf32, #tpu.memory_space<vmem>>, vector<128x128xf32>
    %c0_3 = arith.constant 0 : index
    %c0_4 = arith.constant 0 : index
    %2 = vector.load %arg5[%c0_3, %c0_4] : memref<128x128xf32, #tpu.memory_space<vmem>>, vector<128x128xf32>
    %c0_5 = arith.constant 0 : index
    %c0_6 = arith.constant 0 : index
    %3 = vector.load %arg6[%c0_5, %c0_6] : memref<128x128xf32, #tpu.memory_space<vmem>>, vector<128x128xf32>
    %c0_7 = arith.constant 0 : index
    %c0_8 = arith.constant 0 : index
    %4 = vector.load %arg7[%c0_7, %c0_8] : memref<128x128xf32, #tpu.memory_space<vmem>>, vector<128x128xf32>
    %c0_9 = arith.constant 0 : index
    %c0_10 = arith.constant 0 : index
    %5 = vector.load %arg8[%c0_9, %c0_10] : memref<128x128xf32, #tpu.memory_space<vmem>>, vector<128x128xf32>
    %c0_11 = arith.constant 0 : index
    %c0_12 = arith.constant 0 : index
    %6 = vector.load %arg9[%c0_11, %c0_12] : memref<128x128xf32, #tpu.memory_space<vmem>>, vector<128x128xf32>
    %c0_13 = arith.constant 0 : index
    %c0_14 = arith.constant 0 : index
    %7 = vector.load %arg10[%c0_13, %c0_14] : memref<128x128xf32, #tpu.memory_space<vmem>>, vector<128x128xf32>
    %c0_15 = arith.constant 0 : index
    %c0_16 = arith.constant 0 : index
    %8 = vector.load %arg11[%c0_15, %c0_16] : memref<128x256xf32, #tpu.memory_space<vmem>>, vector<128x256xf32>
    %c0_17 = arith.constant 0 : index
    %c0_18 = arith.constant 0 : index
    %9 = vector.load %arg12[%c0_17, %c0_18] : memref<1x256xf32, #tpu.memory_space<vmem>>, vector<1x256xf32>
    %c0_19 = arith.constant 0 : index
    %c0_20 = arith.constant 0 : index
    %10 = vector.load %arg13[%c0_19, %c0_20] : memref<256x128xf32, #tpu.memory_space<vmem>>, vector<256x128xf32>
    %c0_21 = arith.constant 0 : index
    %c0_22 = arith.constant 0 : index
    %11 = vector.load %arg14[%c0_21, %c0_22] : memref<1x128xf32, #tpu.memory_space<vmem>>, vector<1x128xf32>
    %c0_23 = arith.constant 0 : index
    %c0_24 = arith.constant 0 : index
    %c0_25 = arith.constant 0 : index
    %12 = vector.load %arg1[%c0_23, %c0_24, %c0_25] : memref<1x8x128xf32, #tpu.memory_space<vmem>>, vector<1x8x128xf32>
    %13 = vector.shape_cast %12 : vector<1x8x128xf32> to vector<8x128xf32>
    %c0_26 = arith.constant 0 : index
    %c0_27 = arith.constant 0 : index
    %c0_28 = arith.constant 0 : index
    %14 = vector.load %arg2[%c0_26, %c0_27, %c0_28] : memref<1x8x128xf32, #tpu.memory_space<vmem>>, vector<1x8x128xf32>
    %15 = vector.shape_cast %14 : vector<1x8x128xf32> to vector<8x128xf32>
    %cst = arith.constant dense<0.000000e+00> : vector<8x128xf32>
    %16 = tpu.matmul %15, %0, %cst {dimension_numbers = #tpu.dot_dimension_numbers<[1], [0], [0], [1], [0, 0, 1, 1], [], []>} : vector<8x128xf32>, vector<128x128xf32>, vector<8x128xf32> -> vector<8x128xf32>
    %cst_29 = arith.constant dense<0.000000e+00> : vector<8x128xf32>
    %17 = tpu.matmul %15, %1, %cst_29 {dimension_numbers = #tpu.dot_dimension_numbers<[1], [0], [0], [1], [0, 0, 1, 1], [], []>} : vector<8x128xf32>, vector<128x128xf32>, vector<8x128xf32> -> vector<8x128xf32>
    %cst_30 = arith.constant dense<0.000000e+00> : vector<8x128xf32>
    %18 = tpu.matmul %15, %2, %cst_30 {dimension_numbers = #tpu.dot_dimension_numbers<[1], [0], [0], [1], [0, 0, 1, 1], [], []>} : vector<8x128xf32>, vector<128x128xf32>, vector<8x128xf32> -> vector<8x128xf32>
    %19 = tpu.iota {dimensions = array<i32: 0>} : vector<8x8xi32>
    %20 = tpu.iota {dimensions = array<i32: 1>} : vector<8x8xi32>
    %21 = arith.cmpi sle, %20, %19 : vector<8x8xi32>
    %22 = vector.extract_strided_slice %16 {offsets = [0, 0], sizes = [8, 32], strides = [1, 1]} : vector<8x128xf32> to vector<8x32xf32>
    %23 = vector.extract_strided_slice %17 {offsets = [0, 0], sizes = [8, 32], strides = [1, 1]} : vector<8x128xf32> to vector<8x32xf32>
    %24 = vector.extract_strided_slice %18 {offsets = [0, 0], sizes = [8, 32], strides = [1, 1]} : vector<8x128xf32> to vector<8x32xf32>
    %25 = tpu.transpose %23, [1, 0] : vector<8x32xf32> -> vector<32x8xf32>
    %cst_31 = arith.constant dense<0.000000e+00> : vector<8x8xf32>
    %26 = tpu.matmul %22, %25, %cst_31 {dimension_numbers = #tpu.dot_dimension_numbers<[1], [0], [0], [1], [0, 0, 1, 1], [], []>} : vector<8x32xf32>, vector<32x8xf32>, vector<8x8xf32> -> vector<8x8xf32>
    %cst_32 = arith.constant 0.176776692 : f32
    %27 = vector.broadcast %cst_32 : f32 to vector<8x8xf32>
    %28 = arith.mulf %26, %27 : vector<8x8xf32>
    %cst_33 = arith.constant -1.000000e+30 : f32
    %29 = vector.broadcast %cst_33 : f32 to vector<8x8xf32>
    %30 = arith.select %21, %28, %29 : vector<8x8xi1>, vector<8x8xf32>
    %cst_34 = arith.constant dense<0xFF800000> : vector<8xf32>
    %31 = vector.multi_reduction <maximumf>, %30, %cst_34 [0] : vector<8x8xf32> to vector<8xf32>
    %32 = vector.shape_cast %31 : vector<8xf32> to vector<1x8xf32>
    %33 = vector.broadcast %32 : vector<1x8xf32> to vector<8x8xf32>
    %34 = arith.subf %30, %33 : vector<8x8xf32>
    %35 = math.exp %34 : vector<8x8xf32>
    %cst_35 = arith.constant dense<0.000000e+00> : vector<8xf32>
    %36 = vector.multi_reduction <add>, %35, %cst_35 [0] : vector<8x8xf32> to vector<8xf32>
    %37 = vector.shape_cast %36 : vector<8xf32> to vector<1x8xf32>
    %38 = tpu.reciprocal %37 {approx = true} : vector<1x8xf32> -> vector<1x8xf32>
    %39 = vector.broadcast %38 : vector<1x8xf32> to vector<8x8xf32>
    %40 = arith.mulf %35, %39 : vector<8x8xf32>
    %cst_36 = arith.constant dense<0.000000e+00> : vector<8x32xf32>
    %41 = tpu.matmul %40, %24, %cst_36 {dimension_numbers = #tpu.dot_dimension_numbers<[1], [0], [0], [1], [0, 0, 1, 1], [], []>} : vector<8x8xf32>, vector<8x32xf32>, vector<8x32xf32> -> vector<8x32xf32>
    %42 = vector.extract_strided_slice %16 {offsets = [0, 32], sizes = [8, 32], strides = [1, 1]} : vector<8x128xf32> to vector<8x32xf32>
    %43 = vector.extract_strided_slice %17 {offsets = [0, 32], sizes = [8, 32], strides = [1, 1]} : vector<8x128xf32> to vector<8x32xf32>
    %44 = vector.extract_strided_slice %18 {offsets = [0, 32], sizes = [8, 32], strides = [1, 1]} : vector<8x128xf32> to vector<8x32xf32>
    %45 = tpu.transpose %43, [1, 0] : vector<8x32xf32> -> vector<32x8xf32>
    %cst_37 = arith.constant dense<0.000000e+00> : vector<8x8xf32>
    %46 = tpu.matmul %42, %45, %cst_37 {dimension_numbers = #tpu.dot_dimension_numbers<[1], [0], [0], [1], [0, 0, 1, 1], [], []>} : vector<8x32xf32>, vector<32x8xf32>, vector<8x8xf32> -> vector<8x8xf32>
    %cst_38 = arith.constant 0.176776692 : f32
    %47 = vector.broadcast %cst_38 : f32 to vector<8x8xf32>
    %48 = arith.mulf %46, %47 : vector<8x8xf32>
    %cst_39 = arith.constant -1.000000e+30 : f32
    %49 = vector.broadcast %cst_39 : f32 to vector<8x8xf32>
    %50 = arith.select %21, %48, %49 : vector<8x8xi1>, vector<8x8xf32>
    %cst_40 = arith.constant dense<0xFF800000> : vector<8xf32>
    %51 = vector.multi_reduction <maximumf>, %50, %cst_40 [0] : vector<8x8xf32> to vector<8xf32>
    %52 = vector.shape_cast %51 : vector<8xf32> to vector<1x8xf32>
    %53 = vector.broadcast %52 : vector<1x8xf32> to vector<8x8xf32>
    %54 = arith.subf %50, %53 : vector<8x8xf32>
    %55 = math.exp %54 : vector<8x8xf32>
    %cst_41 = arith.constant dense<0.000000e+00> : vector<8xf32>
    %56 = vector.multi_reduction <add>, %55, %cst_41 [0] : vector<8x8xf32> to vector<8xf32>
    %57 = vector.shape_cast %56 : vector<8xf32> to vector<1x8xf32>
    %58 = tpu.reciprocal %57 {approx = true} : vector<1x8xf32> -> vector<1x8xf32>
    %59 = vector.broadcast %58 : vector<1x8xf32> to vector<8x8xf32>
    %60 = arith.mulf %55, %59 : vector<8x8xf32>
    %cst_42 = arith.constant dense<0.000000e+00> : vector<8x32xf32>
    %61 = tpu.matmul %60, %44, %cst_42 {dimension_numbers = #tpu.dot_dimension_numbers<[1], [0], [0], [1], [0, 0, 1, 1], [], []>} : vector<8x8xf32>, vector<8x32xf32>, vector<8x32xf32> -> vector<8x32xf32>
    %62 = vector.extract_strided_slice %16 {offsets = [0, 64], sizes = [8, 32], strides = [1, 1]} : vector<8x128xf32> to vector<8x32xf32>
    %63 = vector.extract_strided_slice %17 {offsets = [0, 64], sizes = [8, 32], strides = [1, 1]} : vector<8x128xf32> to vector<8x32xf32>
    %64 = vector.extract_strided_slice %18 {offsets = [0, 64], sizes = [8, 32], strides = [1, 1]} : vector<8x128xf32> to vector<8x32xf32>
    %65 = tpu.transpose %63, [1, 0] : vector<8x32xf32> -> vector<32x8xf32>
    %cst_43 = arith.constant dense<0.000000e+00> : vector<8x8xf32>
    %66 = tpu.matmul %62, %65, %cst_43 {dimension_numbers = #tpu.dot_dimension_numbers<[1], [0], [0], [1], [0, 0, 1, 1], [], []>} : vector<8x32xf32>, vector<32x8xf32>, vector<8x8xf32> -> vector<8x8xf32>
    %cst_44 = arith.constant 0.176776692 : f32
    %67 = vector.broadcast %cst_44 : f32 to vector<8x8xf32>
    %68 = arith.mulf %66, %67 : vector<8x8xf32>
    %cst_45 = arith.constant -1.000000e+30 : f32
    %69 = vector.broadcast %cst_45 : f32 to vector<8x8xf32>
    %70 = arith.select %21, %68, %69 : vector<8x8xi1>, vector<8x8xf32>
    %cst_46 = arith.constant dense<0xFF800000> : vector<8xf32>
    %71 = vector.multi_reduction <maximumf>, %70, %cst_46 [0] : vector<8x8xf32> to vector<8xf32>
    %72 = vector.shape_cast %71 : vector<8xf32> to vector<1x8xf32>
    %73 = vector.broadcast %72 : vector<1x8xf32> to vector<8x8xf32>
    %74 = arith.subf %70, %73 : vector<8x8xf32>
    %75 = math.exp %74 : vector<8x8xf32>
    %cst_47 = arith.constant dense<0.000000e+00> : vector<8xf32>
    %76 = vector.multi_reduction <add>, %75, %cst_47 [0] : vector<8x8xf32> to vector<8xf32>
    %77 = vector.shape_cast %76 : vector<8xf32> to vector<1x8xf32>
    %78 = tpu.reciprocal %77 {approx = true} : vector<1x8xf32> -> vector<1x8xf32>
    %79 = vector.broadcast %78 : vector<1x8xf32> to vector<8x8xf32>
    %80 = arith.mulf %75, %79 : vector<8x8xf32>
    %cst_48 = arith.constant dense<0.000000e+00> : vector<8x32xf32>
    %81 = tpu.matmul %80, %64, %cst_48 {dimension_numbers = #tpu.dot_dimension_numbers<[1], [0], [0], [1], [0, 0, 1, 1], [], []>} : vector<8x8xf32>, vector<8x32xf32>, vector<8x32xf32> -> vector<8x32xf32>
    %82 = vector.extract_strided_slice %16 {offsets = [0, 96], sizes = [8, 32], strides = [1, 1]} : vector<8x128xf32> to vector<8x32xf32>
    %83 = vector.extract_strided_slice %17 {offsets = [0, 96], sizes = [8, 32], strides = [1, 1]} : vector<8x128xf32> to vector<8x32xf32>
    %84 = vector.extract_strided_slice %18 {offsets = [0, 96], sizes = [8, 32], strides = [1, 1]} : vector<8x128xf32> to vector<8x32xf32>
    %85 = tpu.transpose %83, [1, 0] : vector<8x32xf32> -> vector<32x8xf32>
    %cst_49 = arith.constant dense<0.000000e+00> : vector<8x8xf32>
    %86 = tpu.matmul %82, %85, %cst_49 {dimension_numbers = #tpu.dot_dimension_numbers<[1], [0], [0], [1], [0, 0, 1, 1], [], []>} : vector<8x32xf32>, vector<32x8xf32>, vector<8x8xf32> -> vector<8x8xf32>
    %cst_50 = arith.constant 0.176776692 : f32
    %87 = vector.broadcast %cst_50 : f32 to vector<8x8xf32>
    %88 = arith.mulf %86, %87 : vector<8x8xf32>
    %cst_51 = arith.constant -1.000000e+30 : f32
    %89 = vector.broadcast %cst_51 : f32 to vector<8x8xf32>
    %90 = arith.select %21, %88, %89 : vector<8x8xi1>, vector<8x8xf32>
    %cst_52 = arith.constant dense<0xFF800000> : vector<8xf32>
    %91 = vector.multi_reduction <maximumf>, %90, %cst_52 [0] : vector<8x8xf32> to vector<8xf32>
    %92 = vector.shape_cast %91 : vector<8xf32> to vector<1x8xf32>
    %93 = vector.broadcast %92 : vector<1x8xf32> to vector<8x8xf32>
    %94 = arith.subf %90, %93 : vector<8x8xf32>
    %95 = math.exp %94 : vector<8x8xf32>
    %cst_53 = arith.constant dense<0.000000e+00> : vector<8xf32>
    %96 = vector.multi_reduction <add>, %95, %cst_53 [0] : vector<8x8xf32> to vector<8xf32>
    %97 = vector.shape_cast %96 : vector<8xf32> to vector<1x8xf32>
    %98 = tpu.reciprocal %97 {approx = true} : vector<1x8xf32> -> vector<1x8xf32>
    %99 = vector.broadcast %98 : vector<1x8xf32> to vector<8x8xf32>
    %100 = arith.mulf %95, %99 : vector<8x8xf32>
    %cst_54 = arith.constant dense<0.000000e+00> : vector<8x32xf32>
    %101 = tpu.matmul %100, %84, %cst_54 {dimension_numbers = #tpu.dot_dimension_numbers<[1], [0], [0], [1], [0, 0, 1, 1], [], []>} : vector<8x8xf32>, vector<8x32xf32>, vector<8x32xf32> -> vector<8x32xf32>
    %102 = tpu.concatenate %41, %61, %81, %101 in 1 : vector<8x32xf32>, vector<8x32xf32>, vector<8x32xf32>, vector<8x32xf32> -> vector<8x128xf32>
    %cst_55 = arith.constant dense<0.000000e+00> : vector<8x128xf32>
    %103 = tpu.matmul %102, %3, %cst_55 {dimension_numbers = #tpu.dot_dimension_numbers<[1], [0], [0], [1], [0, 0, 1, 1], [], []>} : vector<8x128xf32>, vector<128x128xf32>, vector<8x128xf32> -> vector<8x128xf32>
    %104 = arith.addf %103, %15 : vector<8x128xf32>
    %105 = vector.shape_cast %104 : vector<8x128xf32> to vector<1x8x128xf32>
    %cst_56 = arith.constant dense<0.000000e+00> : vector<1xf32>
    %106 = vector.multi_reduction <add>, %105, %cst_56 [1, 2] : vector<1x8x128xf32> to vector<1xf32>
    %107 = vector.shape_cast %106 : vector<1xf32> to vector<1x1x1xf32>
    %108 = vector.extract %107[0, 0, 0] : f32 from vector<1x1x1xf32>
    %cst_57 = arith.constant 1.024000e+03 : f32
    %109 = arith.divf %108, %cst_57 : f32
    %110 = vector.broadcast %109 : f32 to vector<8x128xf32>
    %111 = arith.subf %104, %110 : vector<8x128xf32>
    %112 = arith.mulf %111, %111 : vector<8x128xf32>
    %113 = vector.shape_cast %112 : vector<8x128xf32> to vector<1x8x128xf32>
    %cst_58 = arith.constant dense<0.000000e+00> : vector<1xf32>
    %114 = vector.multi_reduction <add>, %113, %cst_58 [1, 2] : vector<1x8x128xf32> to vector<1xf32>
    %115 = vector.shape_cast %114 : vector<1xf32> to vector<1x1x1xf32>
    %116 = vector.extract %115[0, 0, 0] : f32 from vector<1x1x1xf32>
    %cst_59 = arith.constant 1.024000e+03 : f32
    %117 = arith.divf %116, %cst_59 : f32
    %118 = vector.broadcast %109 : f32 to vector<8x128xf32>
    %119 = arith.subf %104, %118 : vector<8x128xf32>
    %cst_60 = arith.constant 9.99999974E-6 : f32
    %120 = arith.addf %117, %cst_60 : f32
    %121 = math.rsqrt %120 : f32
    %122 = vector.broadcast %121 : f32 to vector<8x128xf32>
    %123 = arith.mulf %119, %122 : vector<8x128xf32>
    %cst_61 = arith.constant dense<0.000000e+00> : vector<8x128xf32>
    %124 = tpu.matmul %123, %4, %cst_61 {dimension_numbers = #tpu.dot_dimension_numbers<[1], [0], [0], [1], [0, 0, 1, 1], [], []>} : vector<8x128xf32>, vector<128x128xf32>, vector<8x128xf32> -> vector<8x128xf32>
    %cst_62 = arith.constant dense<0.000000e+00> : vector<8x128xf32>
    %125 = tpu.matmul %13, %5, %cst_62 {dimension_numbers = #tpu.dot_dimension_numbers<[1], [0], [0], [1], [0, 0, 1, 1], [], []>} : vector<8x128xf32>, vector<128x128xf32>, vector<8x128xf32> -> vector<8x128xf32>
    %cst_63 = arith.constant dense<0.000000e+00> : vector<8x128xf32>
    %126 = tpu.matmul %13, %6, %cst_63 {dimension_numbers = #tpu.dot_dimension_numbers<[1], [0], [0], [1], [0, 0, 1, 1], [], []>} : vector<8x128xf32>, vector<128x128xf32>, vector<8x128xf32> -> vector<8x128xf32>
    %127 = vector.extract_strided_slice %124 {offsets = [0, 0], sizes = [8, 32], strides = [1, 1]} : vector<8x128xf32> to vector<8x32xf32>
    %128 = vector.extract_strided_slice %125 {offsets = [0, 0], sizes = [8, 32], strides = [1, 1]} : vector<8x128xf32> to vector<8x32xf32>
    %129 = vector.extract_strided_slice %126 {offsets = [0, 0], sizes = [8, 32], strides = [1, 1]} : vector<8x128xf32> to vector<8x32xf32>
    %130 = tpu.transpose %128, [1, 0] : vector<8x32xf32> -> vector<32x8xf32>
    %cst_64 = arith.constant dense<0.000000e+00> : vector<8x8xf32>
    %131 = tpu.matmul %127, %130, %cst_64 {dimension_numbers = #tpu.dot_dimension_numbers<[1], [0], [0], [1], [0, 0, 1, 1], [], []>} : vector<8x32xf32>, vector<32x8xf32>, vector<8x8xf32> -> vector<8x8xf32>
    %cst_65 = arith.constant 0.176776692 : f32
    %132 = vector.broadcast %cst_65 : f32 to vector<8x8xf32>
    %133 = arith.mulf %131, %132 : vector<8x8xf32>
    %cst_66 = arith.constant dense<0xFF800000> : vector<8xf32>
    %134 = vector.multi_reduction <maximumf>, %133, %cst_66 [0] : vector<8x8xf32> to vector<8xf32>
    %135 = vector.shape_cast %134 : vector<8xf32> to vector<1x8xf32>
    %136 = vector.broadcast %135 : vector<1x8xf32> to vector<8x8xf32>
    %137 = arith.subf %133, %136 : vector<8x8xf32>
    %138 = math.exp %137 : vector<8x8xf32>
    %cst_67 = arith.constant dense<0.000000e+00> : vector<8xf32>
    %139 = vector.multi_reduction <add>, %138, %cst_67 [0] : vector<8x8xf32> to vector<8xf32>
    %140 = vector.shape_cast %139 : vector<8xf32> to vector<1x8xf32>
    %141 = tpu.reciprocal %140 {approx = true} : vector<1x8xf32> -> vector<1x8xf32>
    %142 = vector.broadcast %141 : vector<1x8xf32> to vector<8x8xf32>
    %143 = arith.mulf %138, %142 : vector<8x8xf32>
    %cst_68 = arith.constant dense<0.000000e+00> : vector<8x32xf32>
    %144 = tpu.matmul %143, %129, %cst_68 {dimension_numbers = #tpu.dot_dimension_numbers<[1], [0], [0], [1], [0, 0, 1, 1], [], []>} : vector<8x8xf32>, vector<8x32xf32>, vector<8x32xf32> -> vector<8x32xf32>
    %145 = vector.extract_strided_slice %124 {offsets = [0, 32], sizes = [8, 32], strides = [1, 1]} : vector<8x128xf32> to vector<8x32xf32>
    %146 = vector.extract_strided_slice %125 {offsets = [0, 32], sizes = [8, 32], strides = [1, 1]} : vector<8x128xf32> to vector<8x32xf32>
    %147 = vector.extract_strided_slice %126 {offsets = [0, 32], sizes = [8, 32], strides = [1, 1]} : vector<8x128xf32> to vector<8x32xf32>
    %148 = tpu.transpose %146, [1, 0] : vector<8x32xf32> -> vector<32x8xf32>
    %cst_69 = arith.constant dense<0.000000e+00> : vector<8x8xf32>
    %149 = tpu.matmul %145, %148, %cst_69 {dimension_numbers = #tpu.dot_dimension_numbers<[1], [0], [0], [1], [0, 0, 1, 1], [], []>} : vector<8x32xf32>, vector<32x8xf32>, vector<8x8xf32> -> vector<8x8xf32>
    %cst_70 = arith.constant 0.176776692 : f32
    %150 = vector.broadcast %cst_70 : f32 to vector<8x8xf32>
    %151 = arith.mulf %149, %150 : vector<8x8xf32>
    %cst_71 = arith.constant dense<0xFF800000> : vector<8xf32>
    %152 = vector.multi_reduction <maximumf>, %151, %cst_71 [0] : vector<8x8xf32> to vector<8xf32>
    %153 = vector.shape_cast %152 : vector<8xf32> to vector<1x8xf32>
    %154 = vector.broadcast %153 : vector<1x8xf32> to vector<8x8xf32>
    %155 = arith.subf %151, %154 : vector<8x8xf32>
    %156 = math.exp %155 : vector<8x8xf32>
    %cst_72 = arith.constant dense<0.000000e+00> : vector<8xf32>
    %157 = vector.multi_reduction <add>, %156, %cst_72 [0] : vector<8x8xf32> to vector<8xf32>
    %158 = vector.shape_cast %157 : vector<8xf32> to vector<1x8xf32>
    %159 = tpu.reciprocal %158 {approx = true} : vector<1x8xf32> -> vector<1x8xf32>
    %160 = vector.broadcast %159 : vector<1x8xf32> to vector<8x8xf32>
    %161 = arith.mulf %156, %160 : vector<8x8xf32>
    %cst_73 = arith.constant dense<0.000000e+00> : vector<8x32xf32>
    %162 = tpu.matmul %161, %147, %cst_73 {dimension_numbers = #tpu.dot_dimension_numbers<[1], [0], [0], [1], [0, 0, 1, 1], [], []>} : vector<8x8xf32>, vector<8x32xf32>, vector<8x32xf32> -> vector<8x32xf32>
    %163 = vector.extract_strided_slice %124 {offsets = [0, 64], sizes = [8, 32], strides = [1, 1]} : vector<8x128xf32> to vector<8x32xf32>
    %164 = vector.extract_strided_slice %125 {offsets = [0, 64], sizes = [8, 32], strides = [1, 1]} : vector<8x128xf32> to vector<8x32xf32>
    %165 = vector.extract_strided_slice %126 {offsets = [0, 64], sizes = [8, 32], strides = [1, 1]} : vector<8x128xf32> to vector<8x32xf32>
    %166 = tpu.transpose %164, [1, 0] : vector<8x32xf32> -> vector<32x8xf32>
    %cst_74 = arith.constant dense<0.000000e+00> : vector<8x8xf32>
    %167 = tpu.matmul %163, %166, %cst_74 {dimension_numbers = #tpu.dot_dimension_numbers<[1], [0], [0], [1], [0, 0, 1, 1], [], []>} : vector<8x32xf32>, vector<32x8xf32>, vector<8x8xf32> -> vector<8x8xf32>
    %cst_75 = arith.constant 0.176776692 : f32
    %168 = vector.broadcast %cst_75 : f32 to vector<8x8xf32>
    %169 = arith.mulf %167, %168 : vector<8x8xf32>
    %cst_76 = arith.constant dense<0xFF800000> : vector<8xf32>
    %170 = vector.multi_reduction <maximumf>, %169, %cst_76 [0] : vector<8x8xf32> to vector<8xf32>
    %171 = vector.shape_cast %170 : vector<8xf32> to vector<1x8xf32>
    %172 = vector.broadcast %171 : vector<1x8xf32> to vector<8x8xf32>
    %173 = arith.subf %169, %172 : vector<8x8xf32>
    %174 = math.exp %173 : vector<8x8xf32>
    %cst_77 = arith.constant dense<0.000000e+00> : vector<8xf32>
    %175 = vector.multi_reduction <add>, %174, %cst_77 [0] : vector<8x8xf32> to vector<8xf32>
    %176 = vector.shape_cast %175 : vector<8xf32> to vector<1x8xf32>
    %177 = tpu.reciprocal %176 {approx = true} : vector<1x8xf32> -> vector<1x8xf32>
    %178 = vector.broadcast %177 : vector<1x8xf32> to vector<8x8xf32>
    %179 = arith.mulf %174, %178 : vector<8x8xf32>
    %cst_78 = arith.constant dense<0.000000e+00> : vector<8x32xf32>
    %180 = tpu.matmul %179, %165, %cst_78 {dimension_numbers = #tpu.dot_dimension_numbers<[1], [0], [0], [1], [0, 0, 1, 1], [], []>} : vector<8x8xf32>, vector<8x32xf32>, vector<8x32xf32> -> vector<8x32xf32>
    %181 = vector.extract_strided_slice %124 {offsets = [0, 96], sizes = [8, 32], strides = [1, 1]} : vector<8x128xf32> to vector<8x32xf32>
    %182 = vector.extract_strided_slice %125 {offsets = [0, 96], sizes = [8, 32], strides = [1, 1]} : vector<8x128xf32> to vector<8x32xf32>
    %183 = vector.extract_strided_slice %126 {offsets = [0, 96], sizes = [8, 32], strides = [1, 1]} : vector<8x128xf32> to vector<8x32xf32>
    %184 = tpu.transpose %182, [1, 0] : vector<8x32xf32> -> vector<32x8xf32>
    %cst_79 = arith.constant dense<0.000000e+00> : vector<8x8xf32>
    %185 = tpu.matmul %181, %184, %cst_79 {dimension_numbers = #tpu.dot_dimension_numbers<[1], [0], [0], [1], [0, 0, 1, 1], [], []>} : vector<8x32xf32>, vector<32x8xf32>, vector<8x8xf32> -> vector<8x8xf32>
    %cst_80 = arith.constant 0.176776692 : f32
    %186 = vector.broadcast %cst_80 : f32 to vector<8x8xf32>
    %187 = arith.mulf %185, %186 : vector<8x8xf32>
    %cst_81 = arith.constant dense<0xFF800000> : vector<8xf32>
    %188 = vector.multi_reduction <maximumf>, %187, %cst_81 [0] : vector<8x8xf32> to vector<8xf32>
    %189 = vector.shape_cast %188 : vector<8xf32> to vector<1x8xf32>
    %190 = vector.broadcast %189 : vector<1x8xf32> to vector<8x8xf32>
    %191 = arith.subf %187, %190 : vector<8x8xf32>
    %192 = math.exp %191 : vector<8x8xf32>
    %cst_82 = arith.constant dense<0.000000e+00> : vector<8xf32>
    %193 = vector.multi_reduction <add>, %192, %cst_82 [0] : vector<8x8xf32> to vector<8xf32>
    %194 = vector.shape_cast %193 : vector<8xf32> to vector<1x8xf32>
    %195 = tpu.reciprocal %194 {approx = true} : vector<1x8xf32> -> vector<1x8xf32>
    %196 = vector.broadcast %195 : vector<1x8xf32> to vector<8x8xf32>
    %197 = arith.mulf %192, %196 : vector<8x8xf32>
    %cst_83 = arith.constant dense<0.000000e+00> : vector<8x32xf32>
    %198 = tpu.matmul %197, %183, %cst_83 {dimension_numbers = #tpu.dot_dimension_numbers<[1], [0], [0], [1], [0, 0, 1, 1], [], []>} : vector<8x8xf32>, vector<8x32xf32>, vector<8x32xf32> -> vector<8x32xf32>
    %199 = tpu.concatenate %144, %162, %180, %198 in 1 : vector<8x32xf32>, vector<8x32xf32>, vector<8x32xf32>, vector<8x32xf32> -> vector<8x128xf32>
    %cst_84 = arith.constant dense<0.000000e+00> : vector<8x128xf32>
    %200 = tpu.matmul %199, %7, %cst_84 {dimension_numbers = #tpu.dot_dimension_numbers<[1], [0], [0], [1], [0, 0, 1, 1], [], []>} : vector<8x128xf32>, vector<128x128xf32>, vector<8x128xf32> -> vector<8x128xf32>
    %201 = arith.addf %200, %123 : vector<8x128xf32>
    %202 = vector.shape_cast %201 : vector<8x128xf32> to vector<1x8x128xf32>
    %cst_85 = arith.constant dense<0.000000e+00> : vector<1xf32>
    %203 = vector.multi_reduction <add>, %202, %cst_85 [1, 2] : vector<1x8x128xf32> to vector<1xf32>
    %204 = vector.shape_cast %203 : vector<1xf32> to vector<1x1x1xf32>
    %205 = vector.extract %204[0, 0, 0] : f32 from vector<1x1x1xf32>
    %cst_86 = arith.constant 1.024000e+03 : f32
    %206 = arith.divf %205, %cst_86 : f32
    %207 = vector.broadcast %206 : f32 to vector<8x128xf32>
    %208 = arith.subf %201, %207 : vector<8x128xf32>
    %209 = arith.mulf %208, %208 : vector<8x128xf32>
    %210 = vector.shape_cast %209 : vector<8x128xf32> to vector<1x8x128xf32>
    %cst_87 = arith.constant dense<0.000000e+00> : vector<1xf32>
    %211 = vector.multi_reduction <add>, %210, %cst_87 [1, 2] : vector<1x8x128xf32> to vector<1xf32>
    %212 = vector.shape_cast %211 : vector<1xf32> to vector<1x1x1xf32>
    %213 = vector.extract %212[0, 0, 0] : f32 from vector<1x1x1xf32>
    %cst_88 = arith.constant 1.024000e+03 : f32
    %214 = arith.divf %213, %cst_88 : f32
    %215 = vector.broadcast %206 : f32 to vector<8x128xf32>
    %216 = arith.subf %201, %215 : vector<8x128xf32>
    %cst_89 = arith.constant 9.99999974E-6 : f32
    %217 = arith.addf %214, %cst_89 : f32
    %218 = math.rsqrt %217 : f32
    %219 = vector.broadcast %218 : f32 to vector<8x128xf32>
    %220 = arith.mulf %216, %219 : vector<8x128xf32>
    %cst_90 = arith.constant dense<0.000000e+00> : vector<8x256xf32>
    %221 = tpu.matmul %220, %8, %cst_90 {dimension_numbers = #tpu.dot_dimension_numbers<[1], [0], [0], [1], [0, 0, 1, 1], [], []>} : vector<8x128xf32>, vector<128x256xf32>, vector<8x256xf32> -> vector<8x256xf32>
    %222 = vector.broadcast %9 : vector<1x256xf32> to vector<8x256xf32>
    %223 = arith.addf %221, %222 : vector<8x256xf32>
    %cst_91 = arith.constant 0.000000e+00 : f32
    %224 = vector.broadcast %cst_91 : f32 to vector<8x256xf32>
    %225 = arith.maximumf %223, %224 : vector<8x256xf32>
    %cst_92 = arith.constant dense<0.000000e+00> : vector<8x128xf32>
    %226 = tpu.matmul %225, %10, %cst_92 {dimension_numbers = #tpu.dot_dimension_numbers<[1], [0], [0], [1], [0, 0, 1, 1], [], []>} : vector<8x256xf32>, vector<256x128xf32>, vector<8x128xf32> -> vector<8x128xf32>
    %227 = vector.broadcast %11 : vector<1x128xf32> to vector<8x128xf32>
    %228 = arith.addf %226, %227 : vector<8x128xf32>
    %229 = arith.addf %228, %220 : vector<8x128xf32>
    %230 = vector.shape_cast %229 : vector<8x128xf32> to vector<1x8x128xf32>
    %cst_93 = arith.constant dense<0.000000e+00> : vector<1xf32>
    %231 = vector.multi_reduction <add>, %230, %cst_93 [1, 2] : vector<1x8x128xf32> to vector<1xf32>
    %232 = vector.shape_cast %231 : vector<1xf32> to vector<1x1x1xf32>
    %233 = vector.extract %232[0, 0, 0] : f32 from vector<1x1x1xf32>
    %cst_94 = arith.constant 1.024000e+03 : f32
    %234 = arith.divf %233, %cst_94 : f32
    %235 = vector.broadcast %234 : f32 to vector<8x128xf32>
    %236 = arith.subf %229, %235 : vector<8x128xf32>
    %237 = arith.mulf %236, %236 : vector<8x128xf32>
    %238 = vector.shape_cast %237 : vector<8x128xf32> to vector<1x8x128xf32>
    %cst_95 = arith.constant dense<0.000000e+00> : vector<1xf32>
    %239 = vector.multi_reduction <add>, %238, %cst_95 [1, 2] : vector<1x8x128xf32> to vector<1xf32>
    %240 = vector.shape_cast %239 : vector<1xf32> to vector<1x1x1xf32>
    %241 = vector.extract %240[0, 0, 0] : f32 from vector<1x1x1xf32>
    %cst_96 = arith.constant 1.024000e+03 : f32
    %242 = arith.divf %241, %cst_96 : f32
    %243 = vector.broadcast %234 : f32 to vector<8x128xf32>
    %244 = arith.subf %229, %243 : vector<8x128xf32>
    %cst_97 = arith.constant 9.99999974E-6 : f32
    %245 = arith.addf %242, %cst_97 : f32
    %246 = math.rsqrt %245 : f32
    %247 = vector.broadcast %246 : f32 to vector<8x128xf32>
    %248 = arith.mulf %244, %247 : vector<8x128xf32>
    %c0_98 = arith.constant 0 : index
    %c0_99 = arith.constant 0 : index
    %c0_100 = arith.constant 0 : index
    %249 = vector.load %arg15[%c0_98, %c0_99, %c0_100] : memref<1x8x128xf32, #tpu.memory_space<vmem>>, vector<1x8x128xf32>
    %250 = vector.shape_cast %249 : vector<1x8x128xf32> to vector<8x128xf32>
    %251 = vector.shape_cast %248 : vector<8x128xf32> to vector<1x8x128xf32>
    tpu.vector_store %arg15[%c0_98, %c0_99, %c0_100], %251 {strides = array<i32>} : memref<1x8x128xf32, #tpu.memory_space<vmem>>, vector<1x8x128xf32>,
    return
  }
  func.func @transform_0(%arg0: i32) -> (i32, i32, i32) {
    %c0_i32 = arith.constant 0 : i32
    %c0_i32_0 = arith.constant 0 : i32
    %c0_i32_1 = arith.constant 0 : i32
    return %arg0, %c0_i32, %c0_i32_0 : i32, i32, i32
  }
  func.func @transform_1(%arg0: i32) -> (i32, i32, i32) {
    %c0_i32 = arith.constant 0 : i32
    %c0_i32_0 = arith.constant 0 : i32
    %c0_i32_1 = arith.constant 0 : i32
    return %arg0, %c0_i32, %c0_i32_0 : i32, i32, i32
  }
  func.func @transform_2(%arg0: i32) -> (i32, i32) {
    %c0_i32 = arith.constant 0 : i32
    %c0_i32_0 = arith.constant 0 : i32
    %c0_i32_1 = arith.constant 0 : i32
    return %c0_i32, %c0_i32_0 : i32, i32
  }
  func.func @transform_3(%arg0: i32) -> (i32, i32) {
    %c0_i32 = arith.constant 0 : i32
    %c0_i32_0 = arith.constant 0 : i32
    %c0_i32_1 = arith.constant 0 : i32
    return %c0_i32, %c0_i32_0 : i32, i32
  }
  func.func @transform_4(%arg0: i32) -> (i32, i32) {
    %c0_i32 = arith.constant 0 : i32
    %c0_i32_0 = arith.constant 0 : i32
    %c0_i32_1 = arith.constant 0 : i32
    return %c0_i32, %c0_i32_0 : i32, i32
  }
  func.func @transform_5(%arg0: i32) -> (i32, i32) {
    %c0_i32 = arith.constant 0 : i32
    %c0_i32_0 = arith.constant 0 : i32
    %c0_i32_1 = arith.constant 0 : i32
    return %c0_i32, %c0_i32_0 : i32, i32
  }
  func.func @transform_6(%arg0: i32) -> (i32, i32) {
    %c0_i32 = arith.constant 0 : i32
    %c0_i32_0 = arith.constant 0 : i32
    %c0_i32_1 = arith.constant 0 : i32
    return %c0_i32, %c0_i32_0 : i32, i32
  }
  func.func @transform_7(%arg0: i32) -> (i32, i32) {
    %c0_i32 = arith.constant 0 : i32
    %c0_i32_0 = arith.constant 0 : i32
    %c0_i32_1 = arith.constant 0 : i32
    return %c0_i32, %c0_i32_0 : i32, i32
  }
  func.func @transform_8(%arg0: i32) -> (i32, i32) {
    %c0_i32 = arith.constant 0 : i32
    %c0_i32_0 = arith.constant 0 : i32
    %c0_i32_1 = arith.constant 0 : i32
    return %c0_i32, %c0_i32_0 : i32, i32
  }
  func.func @transform_9(%arg0: i32) -> (i32, i32) {
    %c0_i32 = arith.constant 0 : i32
    %c0_i32_0 = arith.constant 0 : i32
    %c0_i32_1 = arith.constant 0 : i32
    return %c0_i32, %c0_i32_0 : i32, i32
  }
  func.func @transform_10(%arg0: i32) -> (i32, i32) {
    %c0_i32 = arith.constant 0 : i32
    %c0_i32_0 = arith.constant 0 : i32
    %c0_i32_1 = arith.constant 0 : i32
    return %c0_i32, %c0_i32_0 : i32, i32
  }
  func.func @transform_11(%arg0: i32) -> (i32, i32) {
    %c0_i32 = arith.constant 0 : i32
    %c0_i32_0 = arith.constant 0 : i32
    %c0_i32_1 = arith.constant 0 : i32
    return %c0_i32, %c0_i32_0 : i32, i32
  }
  func.func @transform_12(%arg0: i32) -> (i32, i32) {
    %c0_i32 = arith.constant 0 : i32
    %c0_i32_0 = arith.constant 0 : i32
    %c0_i32_1 = arith.constant 0 : i32
    return %c0_i32, %c0_i32_0 : i32, i32
  }
  func.func @transform_13(%arg0: i32) -> (i32, i32) {
    %c0_i32 = arith.constant 0 : i32
    %c0_i32_0 = arith.constant 0 : i32
    %c0_i32_1 = arith.constant 0 : i32
    return %c0_i32, %c0_i32_0 : i32, i32
  }
  func.func @transform_14(%arg0: i32) -> (i32, i32, i32) {
    %c0_i32 = arith.constant 0 : i32
    %c0_i32_0 = arith.constant 0 : i32
    %c0_i32_1 = arith.constant 0 : i32
    return %arg0, %c0_i32, %c0_i32_0 : i32, i32, i32
  }
}

</mosaic_0001>

<bundles_post_ra>
// kernel: tpu_custom_call.1
= control target key start
LH: loop header
LB: loop body
LE: loop exit
PB: predicated region body
PF: predicated region fallthrough
CT: control target
= control target key end

     0   :  { %s3364_s0 = inlined_call_operand.hbm [shape: f32[2,8,128], index: 0, kind: input, shape index: {}]   ;;  %s3365_s1 = inlined_call_operand.hbm [shape: f32[2,8,128], index: 1, kind: input, shape index: {}]   ;;  %s3366_s2 = inlined_call_operand.hbm [shape: f32[128,128], index: 2, kind: input, shape index: {}]   ;;  %s3367_s3 = inlined_call_operand.hbm [shape: f32[128,128], index: 3, kind: input, shape index: {}]   ;;  %s3368_s4 = inlined_call_operand.hbm [shape: f32[128,128], index: 4, kind: input, shape index: {}]   ;;  %s3369_s5 = inlined_call_operand.hbm [shape: f32[128,128], index: 5, kind: input, shape index: {}]   ;;  %s3370_s6 = inlined_call_operand.hbm [shape: f32[128,128], index: 6, kind: input, shape index: {}]   ;;  %s3371_s7 = inlined_call_operand.hbm [shape: f32[128,128], index: 7, kind: input, shape index: {}]   ;;  %s3372_s8 = inlined_call_operand.hbm [shape: f32[128,128], index: 8, kind: input, shape index: {}]   ;;  %s3373_s9 = inlined_call_operand.hbm [shape: f32[128,128], index: 9, kind: input, shape index: {}]   ;;  %s3374_s10 = inlined_call_operand.hbm [shape: f32[128,256], index: 10, kind: input, shape index: {}]   ;;  %s3375_s11 = inlined_call_operand.vmem [shape: f32[1,256], index: 11, kind: input, shape index: {}]   ;;  %s3376_s12 = inlined_call_operand.hbm [shape: f32[256,128], index: 12, kind: input, shape index: {}]   ;;  %s3377_s13 = inlined_call_operand.vmem [shape: f32[1,128], index: 13, kind: input, shape index: {}]   ;;  %s3378_s14 = inlined_call_operand.hbm [shape: f32[2,8,128], index: 14, kind: output, shape index: {}]  }
   0x1   :  { %3380 = sst [smem:[#allocation33_spill]] %s3366_s2 }
   0x2   :  { %3381 = sst [smem:[#allocation34_spill]] %s3367_s3 }
   0x3   :  { %3382 = sst [smem:[#allocation35_spill]] %s3368_s4 }
   0x4   :  { %3383 = sst [smem:[#allocation36_spill]] %s3369_s5 }
   0x5   :  { %3384 = sst [smem:[#allocation37_spill]] %s3370_s6 }
   0x6   :  { %3385 = sst [smem:[#allocation38_spill]] %s3371_s7 }
   0x7   :  { %3386 = sst [smem:[#allocation39_spill]] %s3372_s8 }
   0x8   :  { %3387 = sst [smem:[#allocation40_spill]] %s3373_s9 }
   0x9   :  { %3388 = sst [smem:[#allocation41_spill]] %s3374_s10 }
   0xa   :  { %3389 = sst [smem:[#allocation42_spill]] %s3376_s12 }
   0xb   :  { %3390 = sst [smem:[#allocation43_spill]] %s3377_s13 }
   0xc   :  { %3391 = sst [smem:[#allocation44_spill]] %s3378_s14 }
   0xd   :  { %19 = vsyncpa [#allocation3], 0 }
   0xe   :  { %21 = vsyncpa [#allocation3 + $0x1], 0 }
   0xf   :  { %22 = vsyncpa [#allocation6], 0 }
  0x10   :  { %24 = vsyncpa [#allocation6 + $0x1], 0 }
  0x11   :  { %25 = vsyncpa [#allocation9], 0 }
  0x12   :  { %26 = vsyncpa [#allocation12], 0 }
  0x13   :  { %27 = vsyncpa [#allocation15], 0 }
  0x14   :  { %28 = vsyncpa [#allocation18], 0 }
  0x15   :  { %29 = vsyncpa [#allocation21], 0 }
  0x16   :  { %30 = vsyncpa [#allocation4], 0 }
  0x17   :  { %32 = vsyncpa [#allocation4 + $0x1], 0  ;;  %s2959_s29 = smov 0   ;;  %s2961_s30 = smov 0  }
  0x18   :  { %s2963_s15 = smov 0   ;;  %s2965_s16 = smov 0  }
  0x19 LB: > { %s3392_s2 = sld [smem:[#allocation33_spill]]  ;;  %s2983_s20 = sadd.s32 4294967295, %s2864_s16   ;;  %s2864_s16 = sphi %s2965_s16, %s3417_s16   ;;  %s2860_s15 = sphi %s2963_s15, %s3416_s15   ;;  %s2856_s30 = sphi %s2961_s30, %s3415_s30   ;;  %s2852_s29 = sphi %s2959_s29, %s3414_s29  }
  0x1a   : > { %p2131_p0 = scmp.ge.s32.totalorder %s2864_s16, 1  ;;  %p59_p1 = scmp.eq.s32.totalorder %s2983_s20, 0 }
  0x1b   : > { %p373_p2 = scmp.lt.s32.totalorder %s2864_s16, 3  ;;  %s2866_s22 = smov [#allocation7]  }
  0x1c   : > { %s386_s23 = sshll.u32 %s2866_s22, 4  ;;  %s3394_s3 = sld [smem:[#allocation34_spill]]  ;;  %s387_s23 = int_to_ptr.vmem [resolvable:$true] %s386_s23 }
  0x1d   : > { %p2988_p3 = pnand %p2131_p0, %p373_p2  ;;  %s3396_s5 = sld [smem:[#allocation36_spill]] }
  0x1e   : > { %s2867_s22 = smov [#allocation8]   ;;  %s2868_s14 = smov 128  }
  0x1f   : > { %s384_s19 = sshll.u32 %s3392_s2, 4  ;;  %p2255_p4 = pneg %p2988_p3  ;;  %s385_s19 = int_to_ptr.hbm [resolvable:$true] %s384_s19 }
  0x20   : > { %s400_s2 = sshll.u32 %s2867_s22, 4  ;;  %s2869_s13 = smov 8   ;;  %s401_s2 = int_to_ptr.vmem [resolvable:$true] %s400_s2 }
  0x21   : > { %p3000_p6 = pnand %p2255_p4, %p59_p1  ;;  %s3397_s7 = sld [smem:[#allocation38_spill]] }
  0x22   : > { %s398_s26 = sshll.u32 %s3394_s3, 4  ;;  %s2870_s17 = smov [#allocation11]   ;;  %s399_s26 = int_to_ptr.hbm [resolvable:$true] %s398_s26 }
  0x23   : > { %s426_s18 = sshll.u32 %s3396_s5, 4  ;;  %s428_s22 = sshll.u32 %s2870_s17, 4  ;;  %s427_s18 = int_to_ptr.hbm [resolvable:$true] %s426_s18  ;;  %s429_s22 = int_to_ptr.vmem [resolvable:$true] %s428_s22 }
  0x24   : > { %2258 = dma.hbm_to_vmem [thread:$0]  (!%p3000_p6), %s385_s19, 2048, %s387_s23, [#allocation6], %s2868_s14, %s2868_s14, %s2869_s13  }
  0x25   : > { %2261 = dma.hbm_to_vmem [thread:$0]  (!%p3000_p6), %s399_s26, 2048, %s401_s2, [#allocation9], %s2868_s14, %s2868_s14, %s2869_s13  }
  0x26   : > { %2267 = dma.hbm_to_vmem [thread:$0]  (!%p3000_p6), %s427_s18, 2048, %s429_s22, [#allocation12], %s2868_s14, %s2868_s14, %s2869_s13  }
  0x27   : > { %s454_s28 = sshll.u32 %s3397_s7, 4  ;;  %s2871_s19 = smov [#allocation14]   ;;  %s455_s28 = int_to_ptr.hbm [resolvable:$true] %s454_s28 }
  0x28   : > { %s456_s23 = sshll.u32 %s2871_s19, 4  ;;  %s3398_s9 = sld [smem:[#allocation40_spill]]  ;;  %s457_s23 = int_to_ptr.vmem [resolvable:$true] %s456_s23 }
  0x29   : > { %2273 = dma.hbm_to_vmem [thread:$0]  (!%p3000_p6), %s455_s28, 2048, %s457_s23, [#allocation15], %s2868_s14, %s2868_s14, %s2869_s13  }
  0x2a   : > { %s3399_s4 = sld [smem:[#allocation35_spill]]  ;;  %s2872_s17 = smov [#allocation17]  }
  0x2b   : > { %s484_s18 = sshll.u32 %s2872_s17, 4  ;;  %s2873_s3 = smov [#allocation10]   ;;  %s485_s18 = int_to_ptr.vmem [resolvable:$true] %s484_s18 }
  0x2c   : > { %s414_s5 = sshll.u32 %s2873_s3, 4  ;;  %s3400_s6 = sld [smem:[#allocation37_spill]]  ;;  %s415_s5 = int_to_ptr.vmem [resolvable:$true] %s414_s5 }
  0x2d   : > { %s3401_s8 = sld [smem:[#allocation39_spill]]  ;;  %s2874_s17 = smov [#allocation13]  }
  0x2e   : > { %s482_s2 = sshll.u32 %s3398_s9, 4  ;;  %s3402_s10 = sld [smem:[#allocation41_spill]]  ;;  %s483_s2 = int_to_ptr.hbm [resolvable:$true] %s482_s2 }
  0x2f   : > { %2279 = dma.hbm_to_vmem [thread:$0]  (!%p3000_p6), %s483_s2, 2048, %s485_s18, [#allocation18], %s2868_s14, %s2868_s14, %s2869_s13  }
  0x30   : > { %s412_s25 = sshll.u32 %s3399_s4, 4  ;;  %s442_s2 = sshll.u32 %s2874_s17, 4  ;;  %s413_s25 = int_to_ptr.hbm [resolvable:$true] %s412_s25  ;;  %s443_s2 = int_to_ptr.vmem [resolvable:$true] %s442_s2 }
  0x31   : > { %2264 = dma.hbm_to_vmem [thread:$0]  (!%p3000_p6), %s413_s25, 2048, %s415_s5, [#allocation9], %s2868_s14, %s2868_s14, %s2869_s13  }
  0x32   : > { %s440_s28 = sshll.u32 %s3400_s6, 4  ;;  %s2875_s18 = smov [#allocation16]   ;;  %s441_s28 = int_to_ptr.hbm [resolvable:$true] %s440_s28 }
  0x33   : > { %s468_s24 = sshll.u32 %s3401_s8, 4  ;;  %s470_s3 = sshll.u32 %s2875_s18, 4  ;;  %s469_s24 = int_to_ptr.hbm [resolvable:$true] %s468_s24  ;;  %s471_s3 = int_to_ptr.vmem [resolvable:$true] %s470_s3 }
  0x34   : > { %2270 = dma.hbm_to_vmem [thread:$0]  (!%p3000_p6), %s441_s28, 2048, %s443_s2, [#allocation12], %s2868_s14, %s2868_s14, %s2869_s13  }
  0x35   : > { %s496_s25 = sshll.u32 %s3402_s10, 4  ;;  %s2876_s5 = smov [#allocation19]   ;;  %s497_s25 = int_to_ptr.hbm [resolvable:$true] %s496_s25 }
  0x36   : > { %2276 = dma.hbm_to_vmem [thread:$0]  (!%p3000_p6), %s469_s24, 2048, %s471_s3, [#allocation15], %s2868_s14, %s2868_s14, %s2869_s13  }
  0x37   : > { %s498_s28 = sshll.u32 %s2876_s5, 4  ;;  %s3403_s12 = sld [smem:[#allocation42_spill]]  ;;  %s499_s28 = int_to_ptr.vmem [resolvable:$true] %s498_s28 }
  0x38   : > { %s2877_s2 = smov 256   ;;  %s2878_s18 = smov 16  }
  0x39   : > { %2282 = dma.hbm_to_vmem [thread:$0]  (!%p3000_p6), %s497_s25, 4096, %s499_s28, [#allocation18], %s2877_s2, %s2877_s2, %s2878_s18  }
  0x3a   : > { %s2879_s24 = smov [#allocation20]   ;;  %s2130_s22 = sadd.s32 4294967294, %s2864_s16  }
  0x3b   : > { %s515_s3 = sshll.u32 %s2879_s24, 4  ;;  %s3077_s19 = sadd.s32 1, %s2864_s16   ;;  %s516_s3 = int_to_ptr.vmem [resolvable:$true] %s515_s3 }
  0x3c   : > { %s42_s5 = ssub.s32 %s2864_s16, %s3077_s19  ;;  %s45_s25 = sadd.s32 1, %s2860_s15 }
  0x3d   : > { %s513_s17 = sshll.u32 %s3403_s12, 4  ;;  %p43_p7 = scmp.eq.s32.totalorder %s42_s5, 0  ;;  %s514_s17 = int_to_ptr.hbm [resolvable:$true] %s513_s17 }
  0x3e   : > { %2285 = dma.hbm_to_vmem [thread:$0]  (!%p3000_p6), %s514_s17, 4096, %s516_s3, [#allocation21], %s2868_s14, %s2868_s14, %s2869_s13  }
  0x3f   : > { %p52_p8 = scmp.ne.s32.totalorder %s2860_s15, %s2856_s30  ;;  %p53_p9 = scmp.eq.s32.totalorder %s2864_s16, 0 }
  0x40   : > { %p58_p10 = scmp.ne.s32.totalorder %s2856_s30, %s2852_s29  ;;  %p360_p13 = scmp.eq.s32.totalorder %s2983_s20, 1 }
  0x41   : > { %s3088_s28 = scalar_select %p43_p7, %s2860_s15, %s45_s25  }
  0x42   : > { %p3090_p11 = por %p53_p9, %p52_p8  ;;  %p3096_p12 = por %p59_p1, %p58_p10 }
  0x43   : > { %3404 = sst [smem:[#allocation32_spill]] %s3088_s28  ;;  %p366_p0 = scmp.eq.s32.totalorder %s2130_s22, 1 }
  0x44   : > { %p2307_p2 = scmp.lt.s32.totalorder %s2864_s16, 2  ;;  %s532_s14 = sand.u32 1, %s2860_s15  }
  0x45   : > { %p3103_p4 = por %p360_p13, %p52_p8  ;;  %p3107_p6 = por %p366_p0, %p58_p10 }
  0x46   : > { %s3111_s17 = sshll.u32 %s532_s14, 3  ;;  %s2144_s2 = sshll.u32 %s2864_s16, 3 }
  0x47   : > { %s540_s3 = scalar_lea.hbm %s3364_s0, %s2144_s2  ;;  %s536_s5 = scalar_lea.vmem [#allocation2], %s3111_s17 }
  0x48   : > { %s544_s22 = sshll.u32 %s536_s5, 4  ;;  %s542_s25 = sshll.u32 %s540_s3, 4  ;;  %s545_s22 = int_to_ptr.vmem [resolvable:$true] %s544_s22  ;;  %s543_s25 = int_to_ptr.hbm [resolvable:$true] %s542_s25 }
  0x49   : > { %p3120_p7 = pnand %p2307_p2, %p3090_p11  ;;  %s559_s8 = scalar_lea.hbm %s3365_s1, %s2144_s2 }
  0x4a   : > { %s551_s9 = sand.u32 1, %s2864_s16   ;;  %s533_s10 = scalar_lea.sflag [#allocation3], %s532_s14 }
  0x4b   : > { %s2710_s18 = sshra.s32 %s543_s25, 4  ;;  %p2714_p9 = pneg %p3120_p7  ;;  %s2711_s18 = int_to_ptr.hbm [resolvable:$true] %s2710_s18 }
  0x4c   : > { %s2712_s24 = scalar_lea.hbm %s2711_s18, 8  ;;  %s2717_s5 = scalar_lea.hbm %s3364_s0, 16 }
  0x4d   : > { %p2713_p8 = scmp.ne.s32.totalorder %s2711_s18, %s2712_s24  ;;  %p2718_p13 = scmp.lt.s32.totalorder %s2711_s18, %s3364_s0 }
  0x4e   : > { %p2719_p0 = scmp.lt.s32.totalorder %s2717_s5, %s2712_s24 }
  0x4f   : > { %p2715_p10 = pnand %p2714_p9, %p2713_p8 }
  0x50   : > { %p2720_p2 = por %p2719_p0, %p2718_p13 }
  0x51   : > { %p2716_p11 = pneg %p2715_p10 }
  0x53   : > { %p2721_p5 = pnand %p2720_p2, %p2716_p11 }
  0x55   : > { %2724 = shalt.err (!%p2721_p5)
}
  0x56   : > { %2289 = dma.hbm_to_vmem [thread:$0]  (!%p3120_p7), %s543_s25, 128, %s545_s22, %s533_s10  }
  0x57   : > { %s561_s14 = sshll.u32 %s559_s8, 4  ;;  %s555_s2 = scalar_lea.vmem [#allocation5], %s3111_s17  ;;  %s562_s14 = int_to_ptr.hbm [resolvable:$true] %s561_s14 }
  0x58   : > { %s563_s12 = sshll.u32 %s555_s2, 4  ;;  %s552_s27 = scalar_lea.sflag [#allocation6], %s551_s9  ;;  %s564_s12 = int_to_ptr.vmem [resolvable:$true] %s563_s12 }
  0x59   : > { %s2740_s3 = sshra.s32 %s562_s14, 4  ;;  %s2747_s5 = scalar_lea.hbm %s3365_s1, 16  ;;  %s2741_s3 = int_to_ptr.hbm [resolvable:$true] %s2740_s3 }
  0x5a   : > { %s2742_s28 = scalar_lea.hbm %s2741_s3, 8  ;;  %p2748_p5 = scmp.lt.s32.totalorder %s2741_s3, %s3365_s1 }
  0x5b   : > { %p2743_p8 = scmp.ne.s32.totalorder %s2741_s3, %s2742_s28  ;;  %p2749_p13 = scmp.lt.s32.totalorder %s2747_s5, %s2742_s28 }
  0x5d   : > { %p2745_p10 = pnand %p2743_p8, %p2714_p9  ;;  %p2750_p0 = por %p2749_p13, %p2748_p5 }
  0x5f   : > { %p2746_p11 = pneg %p2745_p10 }
  0x61   : > { %p2751_p2 = pnand %p2750_p0, %p2746_p11 }
  0x63   : > { %2754 = shalt.err (!%p2751_p2)
}
  0x64   : > { %2292 = dma.hbm_to_vmem [thread:$0]  (!%p3120_p7), %s562_s14, 128, %s564_s12, %s552_s27  }
  0x65   : > { %572 = sbr.rel (%p2988_p3) target bundleno = 3515 (0xdbb), region = 76  ;;  %s3156_s8 = sand.u32 (!%p2988_p3), 1, %s2856_s30  }
  0x66   : > { %s3159_s9 = sshll.u32 (!%p2988_p3), %s3156_s8, 3  ;;  %s575_s17 = scalar_lea.sflag (!%p2988_p3), [#allocation3], %s3156_s8 }
  0x67   : > { %s578_s28 = scalar_lea.vmem (!%p2988_p3), [#allocation2], %s3159_s9 }
  0x6a   : > { %2815 = dma.done.wait (%p3096_p12), %s575_s17, 128  }
  0x6b   : > { %2817 = vsyncadd (%p3096_p12), %s575_s17, 4294967168  ;;  %s584_s4 = sand.u32 1, %s2983_s20   ;;  %s588_s21 = scalar_lea.vmem [#allocation5], %s3159_s9 }
  0x6c   : > { %s585_s12 = scalar_lea.sflag [#allocation6], %s584_s4 }
  0x6d   : > { %2819 = dma.done.wait (%p3096_p12), %s585_s12, 128  }
  0x6e   : > { %2821 = vsyncadd (%p3096_p12), %s585_s12, 4294967168 }
  0x6f   : > { %2823 = dma.done.wait (%p59_p1), [#allocation6], 2048  }
  0x70   : > { %2825 = vsyncadd (%p59_p1), [#allocation6], 4294965248 }
  0x71   : > { %2827 = dma.done.wait (%p59_p1), [#allocation9], 4096  }
  0x72   : > { %2829 = vsyncadd (%p59_p1), [#allocation9], 4294963200 }
  0x73   : > { %2831 = dma.done.wait (%p59_p1), [#allocation12], 4096  }
  0x74   : > { %2833 = vsyncadd (%p59_p1), [#allocation12], 4294963200 }
  0x75   : > { %2835 = dma.done.wait (%p59_p1), [#allocation15], 4096  }
  0x76   : > { %2837 = vsyncadd (%p59_p1), [#allocation15], 4294963200 }
  0x77   : > { %2839 = dma.done.wait (%p59_p1), [#allocation18], 6144  }
  0x78   : > { %2841 = vsyncadd (%p59_p1), [#allocation18], 4294961152 }
  0x79   : > { %2843 = dma.done.wait (%p59_p1), [#allocation21], 4096  }
  0x7a   : > { %2845 = vsyncadd (%p59_p1), [#allocation21], 4294963200  ;;  %v720_v0 = vld [vmem:[#allocation8 + $0x78] sm:$0xff]  ;;  %v719_v2 = vld [vmem:[#allocation8 + $0x70] sm:$0xff]  ;;  %vm950_vm0 = vcmask 261120   ;;  %s2880_s13 = smov 32   ;;  %v945_v55 = vlaneseq }
  0x7b   : > { %v736_v1 = vld [vmem:[#allocation10 + $0x78] sm:$0xff]  ;;  %905 = vmatpush.msra.mxu1 %v720_v0  ;;  %v735_v3 = vld [vmem:[#allocation10 + $0x70] sm:$0xff]  ;;  %v718_v5 = vld [vmem:[#allocation8 + $0x68] sm:$0xff]  ;;  %s2881_s22 = smov 96   ;;  %s2882_s25 = smov 64   ;;  %vm979_vm2 = vcmask 64512  }
  0x7c   : > { %925 = vmatpush.msra.mxu2 %v736_v1  ;;  %v704_v4 = vld [vmem:[#allocation7 + $0x78] sm:$0xff]  ;;  %v734_v6 = vld [vmem:[#allocation10 + $0x68] sm:$0xff]  ;;  %v703_v7 = vld [vmem:[#allocation7 + $0x70] sm:$0xff]  ;;  %v3218_v57 = vshrl.u32 %v945_v55, 7  ;;  %v3220_v58 = vand.u32 127, %v945_v55  ;;  %vm1261_vm3 = vcmask 523264  }
  0x7d   : > { %885 = vmatpush.msra.mxu0 %v704_v4  ;;  %906 = vmatpush.msra.mxu1 %v719_v2  ;;  %v702_v8 = vld [vmem:[#allocation7 + $0x68] sm:$0xff]  ;;  %v717_v9 = vld [vmem:[#allocation8 + $0x60] sm:$0xff]  ;;  %v716_v12 = vld [vmem:[#allocation8 + $0x58] sm:$0xff]  ;;  %vm1263_vm4 = vcmask 785408  }
  0x7e   : > { %926 = vmatpush.msra.mxu2 %v735_v3  ;;  %v733_v10 = vld [vmem:[#allocation10 + $0x60] sm:$0xff]  ;;  %v732_v13 = vld [vmem:[#allocation10 + $0x58] sm:$0xff]  ;;  %v715_v15 = vld [vmem:[#allocation8 + $0x50] sm:$0xff]  ;;  %vm949_vm1 = vcmp.le.s32.totalorder %v3220_v58, %v3218_v57 }
  0x7f   : > { %886 = vmatpush.msra.mxu0 %v703_v7  ;;  %907 = vmatpush.msra.mxu1 %v718_v5  ;;  %v701_v11 = vld [vmem:[#allocation7 + $0x60] sm:$0xff]  ;;  %v700_v14 = vld [vmem:[#allocation7 + $0x58] sm:$0xff]  ;;  %v731_v16 = vld [vmem:[#allocation10 + $0x50] sm:$0xff] }
  0x80   : > { %927 = vmatpush.msra.mxu2 %v734_v6  ;;  %v699_v17 = vld [vmem:[#allocation7 + $0x50] sm:$0xff]  ;;  %v714_v18 = vld [vmem:[#allocation8 + $0x48] sm:$0xff]  ;;  %v713_v21 = vld [vmem:[#allocation8 + $0x40] sm:$0xff] }
  0x81   : > { %887 = vmatpush.msra.mxu0 %v702_v8  ;;  %908 = vmatpush.msra.mxu1 %v717_v9  ;;  %v730_v19 = vld [vmem:[#allocation10 + $0x48] sm:$0xff]  ;;  %v729_v22 = vld [vmem:[#allocation10 + $0x40] sm:$0xff]  ;;  %v712_v24 = vld [vmem:[#allocation8 + $0x38] sm:$0xff] }
  0x82   : > { %928 = vmatpush.msra.mxu2 %v733_v10  ;;  %v698_v20 = vld [vmem:[#allocation7 + $0x48] sm:$0xff]  ;;  %v697_v23 = vld [vmem:[#allocation7 + $0x40] sm:$0xff]  ;;  %v728_v25 = vld [vmem:[#allocation10 + $0x38] sm:$0xff] }
  0x83   : > { %888 = vmatpush.msra.mxu0 %v701_v11  ;;  %909 = vmatpush.msra.mxu1 %v716_v12  ;;  %v696_v26 = vld [vmem:[#allocation7 + $0x38] sm:$0xff]  ;;  %v711_v27 = vld [vmem:[#allocation8 + $0x30] sm:$0xff]  ;;  %v710_v30 = vld [vmem:[#allocation8 + $0x28] sm:$0xff] }
  0x84   : > { %929 = vmatpush.msra.mxu2 %v732_v13  ;;  %v727_v28 = vld [vmem:[#allocation10 + $0x30] sm:$0xff]  ;;  %v726_v31 = vld [vmem:[#allocation10 + $0x28] sm:$0xff]  ;;  %v709_v33 = vld [vmem:[#allocation8 + $0x20] sm:$0xff] }
  0x85   : > { %889 = vmatpush.msra.mxu0 %v700_v14  ;;  %910 = vmatpush.msra.mxu1 %v715_v15  ;;  %v695_v29 = vld [vmem:[#allocation7 + $0x30] sm:$0xff]  ;;  %v694_v32 = vld [vmem:[#allocation7 + $0x28] sm:$0xff]  ;;  %v725_v34 = vld [vmem:[#allocation10 + $0x20] sm:$0xff] }
  0x86   : > { %930 = vmatpush.msra.mxu2 %v731_v16  ;;  %v693_v35 = vld [vmem:[#allocation7 + $0x20] sm:$0xff]  ;;  %v708_v36 = vld [vmem:[#allocation8 + $0x18] sm:$0xff]  ;;  %v707_v39 = vld [vmem:[#allocation8 + $0x10] sm:$0xff] }
  0x87   : > { %890 = vmatpush.msra.mxu0 %v699_v17  ;;  %911 = vmatpush.msra.mxu1 %v714_v18  ;;  %v724_v37 = vld [vmem:[#allocation10 + $0x18] sm:$0xff]  ;;  %v723_v40 = vld [vmem:[#allocation10 + $0x10] sm:$0xff]  ;;  %v706_v42 = vld [vmem:[#allocation8 + $0x8] sm:$0xff] }
  0x88   : > { %931 = vmatpush.msra.mxu2 %v730_v19  ;;  %v692_v38 = vld [vmem:[#allocation7 + $0x18] sm:$0xff]  ;;  %v691_v41 = vld [vmem:[#allocation7 + $0x10] sm:$0xff]  ;;  %v722_v43 = vld [vmem:[#allocation10 + $0x8] sm:$0xff] }
  0x89   : > { %891 = vmatpush.msra.mxu0 %v698_v20  ;;  %912 = vmatpush.msra.mxu1 %v713_v21  ;;  %v690_v44 = vld [vmem:[#allocation7 + $0x8] sm:$0xff]  ;;  %v705_v45 = vld [vmem:[#allocation8] sm:$0xff]  ;;  %v3199_v47 = vld [vmem:[%s588_s21] sm:$0xff]  ;;  %s1927_s21 = scalar_lea.sflag [#allocation4], %s3156_s8 }
  0x8a   : > { %932 = vmatpush.msra.mxu2 %v729_v22  ;;  %v721_v46 = vld [vmem:[#allocation10] sm:$0xff] }
  0x8b   : > { %892 = vmatpush.msra.mxu0 %v697_v23  ;;  %913 = vmatpush.msra.mxu1 %v712_v24  ;;  %v689_v48 = vld [vmem:[#allocation7] sm:$0xff] }
  0x8c   : > { %933 = vmatpush.msra.mxu2 %v728_v25 }
  0x8d   : > { %893 = vmatpush.msra.mxu0 %v696_v26  ;;  %914 = vmatpush.msra.mxu1 %v711_v27 }
  0x8e   : > { %934 = vmatpush.msra.mxu2 %v727_v28 }
  0x8f   : > { %894 = vmatpush.msra.mxu0 %v695_v29  ;;  %915 = vmatpush.msra.mxu1 %v710_v30 }
  0x90   : > { %935 = vmatpush.msra.mxu2 %v726_v31 }
  0x91   : > { %895 = vmatpush.msra.mxu0 %v694_v32  ;;  %916 = vmatpush.msra.mxu1 %v709_v33 }
  0x92   : > { %936 = vmatpush.msra.mxu2 %v725_v34 }
  0x93   : > { %896 = vmatpush.msra.mxu0 %v693_v35  ;;  %917 = vmatpush.msra.mxu1 %v708_v36 }
  0x94   : > { %937 = vmatpush.msra.mxu2 %v724_v37 }
  0x95   : > { %897 = vmatpush.msra.mxu0 %v692_v38  ;;  %918 = vmatpush.msra.mxu1 %v707_v39 }
  0x96   : > { %938 = vmatpush.msra.mxu2 %v723_v40 }
  0x97   : > { %898 = vmatpush.msra.mxu0 %v691_v41  ;;  %919 = vmatpush.msra.mxu1 %v706_v42 }
  0x98   : > { %939 = vmatpush.msra.mxu2 %v722_v43 }
  0x99   : > { %899 = vmatpush.msra.mxu0 %v690_v44  ;;  %920 = vmatpush.msra.mxu1 %v705_v45 }
  0x9a   : > { %940 = vmatpush.msra.mxu2 %v721_v46  ;;  %921 = vmatmul.f32.vlgmr.msra.gmra.mxu1 %v3199_v47 }
  0x9b   : > { %941 = vmatmul.f32.vlgmr.msra.gmra.mxu2 %v3199_v47  ;;  %900 = vmatpush.msra.mxu0 %v689_v48 }
  0x9c   : > { %901 = vmatmul.f32.vlgmr.msra.gmra.mxu0 %v3199_v47 }
 0x117   : > { %v922_v49 = vpop.f32.mrf.mxu1 }
 0x118   : > { %1175 = vrot.lane.b32.xlu2 %v922_v49, %s2880_s13  ;;  %1024 = vrot.lane.b32.xlu0 %v922_v49, %s2881_s22 }
 0x119   : > { %2161 = vmatpush.xpose.msk.msrb.mxu0 %vm950_vm0, %v922_v49  ;;  %v902_v50 = vpop.f32.mrf.mxu0 }
 0x11c   : > { %2162 = vmatmul.msk.f32.vlgmr.msrb.gmra.mxu0 %vm950_vm0, %v902_v50 }
 0x11e   : > { %v942_v51 = vpop.f32.mrf.mxu2 }
 0x11f   : > { %1072 = vrot.lane.b32.xlu1 %v942_v51, %s2881_s22  ;;  %1017 = vmatpush.msrb.mxu2 %v942_v51 }
 0x120   : > { %1098 = vrot.lane.b32.xlu2 %v902_v50, %s2882_s25  ;;  %1022 = vrot.lane.b32.xlu0 %v902_v50, %s2881_s22 }
 0x127   : > { %1100 = vrot.lane.b32.xlu1 %v922_v49, %s2882_s25 }
 0x128   : > { %1173 = vrot.lane.b32.xlu0 %v902_v50, %s2880_s13  ;;  %1147 = vrot.lane.b32.xlu2 %v942_v51, %s2882_s25 }
 0x12f   : > { %1222 = vrot.lane.b32.xlu1 %v942_v51, %s2880_s13 }
 0x172   : > { %v1176_v53 = vpop.permute.xlu2 %1175 }
 0x17a   : > { %v1099_v19 = vpop.permute.xlu2 %1098 }
 0x182   : > { %v1148_v20 = vpop.permute.xlu2 %1147 }
 0x183   : > { %1168 = vmatpush.msra.mxu0 %v1148_v20 }
 0x18a   : > { %v1025_v52 = vpop.permute.xlu0 %1024 }
 0x18b   : > { %2164 = vmatpush.xpose.msk.msrb.mxu1 %vm950_vm0, %v1025_v52 }
 0x18f   : > { %2170 = vmatpush.xpose.msk.msra.mxu1 %vm950_vm0, %v1176_v53 }
 0x191   : > { %v1073_v54 = vpop.permute.xlu1 %1072 }
 0x192   : > { %1093 = vmatpush.msra.mxu3 %v1073_v54  ;;  %v1023_v56 = vpop.permute.xlu0 %1022 }
 0x193   : > { %2165 = vmatmul.msk.f32.vlgmr.msrb.gmra.mxu1 %vm950_vm0, %v1023_v56 }
 0x199   : > { %v1101_v59 = vpop.permute.xlu1 %1100  ;;  %v974_v60 = vpop.f32.mrf.mxu0 }
 0x19a   : > { %2167 = vmatpush.xpose.msk.msrb.mxu3 %vm950_vm0, %v1101_v59  ;;  %v977_v61 = vmul.f32 0.17677669, %v974_v60  ;;  %v1174_v62 = vpop.permute.xlu0 %1173 }
 0x19b   : > { %2171 = vmatmul.msk.f32.vlgmr.msra.gmra.mxu1 %vm950_vm0, %v1174_v62 }
 0x19c   : > { %v978_v63 = vsel %vm949_vm1, %v977_v61, -1e+30 }
 0x19d   : > { %v980_v0 = vsel %vm979_vm2, %v978_v63, -inf }
 0x19e   : > { %v981_v1 = vrot.slane %v980_v0, 4 }
 0x1a0   : > { %v982_v2 = vmax.f32 %v980_v0, %v981_v1 }
 0x1a1   : > { %v1223_v37 = vpop.permute.xlu1 %1222 }
 0x1a2   : > { %v983_v3 = vrot.slane %v982_v2, 2  ;;  %1243 = vmatpush.msra.mxu2 %v1223_v37  ;;  %v743_v37 = vld [vmem:[#allocation11 + $0x30] sm:$0xff] }
 0x1a4   : > { %v984_v4 = vmax.f32 %v982_v2, %v983_v3 }
 0x1a6   : > { %v985_v5 = vrot.slane %v984_v4, 1 }
 0x1a8   : > { %v986_v6 = vmax.f32 %v984_v4, %v985_v5 }
 0x1aa   : > { %v987_v7 = vsub.f32 %v978_v63, %v986_v6 }
 0x1ac   : > { %v988_v8 = vmul.f32 1.442695, %v987_v7 }
 0x1ae   : > { %2370 = vpow2.f32 %v988_v8 }
 0x1b4   : > { %v2371_v9 = vpop.eup %2370 }
 0x1b5   : > { %v990_v10 = vsel %vm979_vm2, %v2371_v9, 0.0 }
 0x1b6   : > { %v991_v11 = vrot.slane %v990_v10, 4 }
 0x1b8   : > { %v992_v12 = vadd.f32 %v991_v11, %v990_v10 }
 0x1ba   : > { %v993_v13 = vrot.slane %v992_v12, 2 }
 0x1bc   : > { %v994_v14 = vadd.f32 %v993_v13, %v992_v12 }
 0x1be   : > { %v995_v15 = vrot.slane %v994_v14, 1 }
 0x1c0   : > { %v996_v16 = vadd.f32 %v995_v15, %v994_v14 }
 0x1c2   : > { %2372 = vrcp.f32 %v996_v16 }
 0x1c8   : > { %v2373_v17 = vpop.eup %2372 }
 0x1c9   : > { %v998_v18 = vmul.f32 %v2373_v17, %v2371_v9 }
 0x1cb   : > { %2163 = vmatmul.msk.f32.vlgmr.msrb.gmra.mxu2 %vm979_vm2, %v998_v18 }
 0x210   : > { %v1047_v21 = vpop.f32.mrf.mxu1 }
 0x211   : > { %v1050_v22 = vmul.f32 0.17677669, %v1047_v21 }
 0x213   : > { %v1051_v23 = vsel %vm949_vm1, %v1050_v22, -1e+30 }
 0x214   : > { %v1052_v24 = vsel %vm979_vm2, %v1051_v23, -inf }
 0x215   : > { %v1053_v25 = vrot.slane %v1052_v24, 4 }
 0x217   : > { %v1054_v26 = vmax.f32 %v1052_v24, %v1053_v25 }
 0x218   : > { %v1198_v27 = vpop.f32.mrf.mxu1 }
 0x219   : > { %v1055_v28 = vrot.slane %v1054_v26, 2  ;;  %v1201_v29 = vmul.f32 0.17677669, %v1198_v27 }
 0x21b   : > { %v1056_v30 = vmax.f32 %v1054_v26, %v1055_v28  ;;  %v1202_v31 = vsel %vm949_vm1, %v1201_v29, -1e+30  ;;  %v752_v28 = vld [vmem:[#allocation11 + $0x78] sm:$0xff]  ;;  %v751_v29 = vld [vmem:[#allocation11 + $0x70] sm:$0xff] }
 0x21c   : > { %v1203_v32 = vsel %vm979_vm2, %v1202_v31, -inf }
 0x21d   : > { %v1057_v33 = vrot.slane %v1056_v30, 1  ;;  %v1204_v34 = vrot.slane %v1203_v32, 4 }
 0x21f   : > { %v1058_v35 = vmax.f32 %v1056_v30, %v1057_v33  ;;  %v1205_v36 = vmax.f32 %v1203_v32, %v1204_v34  ;;  %v750_v30 = vld [vmem:[#allocation11 + $0x68] sm:$0xff]  ;;  %v748_v32 = vld [vmem:[#allocation11 + $0x58] sm:$0xff]  ;;  %v747_v33 = vld [vmem:[#allocation11 + $0x50] sm:$0xff] }
 0x220   : > { %v746_v34 = vld [vmem:[#allocation11 + $0x48] sm:$0xff] }
 0x221   : > { %v1059_v38 = vsub.f32 %v1051_v23, %v1058_v35  ;;  %v1206_v39 = vrot.slane %v1205_v36, 2  ;;  %v745_v35 = vld [vmem:[#allocation11 + $0x40] sm:$0xff] }
 0x223   : > { %v1060_v40 = vmul.f32 1.442695, %v1059_v38  ;;  %v1207_v41 = vmax.f32 %v1205_v36, %v1206_v39  ;;  %v744_v36 = vld [vmem:[#allocation11 + $0x38] sm:$0xff]  ;;  %v742_v38 = vld [vmem:[#allocation11 + $0x28] sm:$0xff]  ;;  %v741_v39 = vld [vmem:[#allocation11 + $0x20] sm:$0xff] }
 0x225   : > { %2374 = vpow2.f32 %v1060_v40  ;;  %v1208_v42 = vrot.slane %v1207_v41, 1  ;;  %v740_v40 = vld [vmem:[#allocation11 + $0x18] sm:$0xff] }
 0x227   : > { %v1209_v43 = vmax.f32 %v1207_v41, %v1208_v42  ;;  %v739_v41 = vld [vmem:[#allocation11 + $0x10] sm:$0xff]  ;;  %v738_v42 = vld [vmem:[#allocation11 + $0x8] sm:$0xff] }
 0x229   : > { %v1210_v44 = vsub.f32 %v1202_v31, %v1209_v43  ;;  %v749_v31 = vld [vmem:[#allocation11 + $0x60] sm:$0xff] }
 0x22b   : > { %v2375_v45 = vpop.eup %2374  ;;  %v1211_v46 = vmul.f32 1.442695, %v1210_v44  ;;  %v737_v44 = vld [vmem:[#allocation11] sm:$0xff] }
 0x22c   : > { %v1062_v48 = vsel %vm979_vm2, %v2375_v45, 0.0 }
 0x22d   : > { %v1063_v49 = vrot.slane %v1062_v48, 4  ;;  %2376 = vpow2.f32 %v1211_v46 }
 0x22f   : > { %v1064_v50 = vadd.f32 %v1063_v49, %v1062_v48 }
 0x231   : > { %v1065_v51 = vrot.slane %v1064_v50, 2 }
 0x233   : > { %v2377_v52 = vpop.eup %2376  ;;  %v1066_v53 = vadd.f32 %v1065_v51, %v1064_v50 }
 0x234   : > { %v1213_v54 = vsel %vm979_vm2, %v2377_v52, 0.0 }
 0x235   : > { %v1214_v55 = vrot.slane %v1213_v54, 4  ;;  %v1067_v56 = vrot.slane %v1066_v53, 1 }
 0x237   : > { %v1215_v59 = vadd.f32 %v1214_v55, %v1213_v54  ;;  %v1068_v60 = vadd.f32 %v1067_v56, %v1066_v53  ;;  %v2883_v54 = vmov 1024.0  }
 0x239   : > { %v1216_v61 = vrot.slane %v1215_v59, 2  ;;  %2378 = vrcp.f32 %v1068_v60 }
 0x23b   : > { %v1217_v62 = vadd.f32 %v1216_v61, %v1215_v59 }
 0x23d   : > { %v1218_v63 = vrot.slane %v1217_v62, 1 }
 0x23f   : > { %v2379_v0 = vpop.eup %2378  ;;  %v1219_v1 = vadd.f32 %v1218_v63, %v1217_v62 }
 0x240   : > { %v1070_v2 = vmul.f32 %v2379_v0, %v2375_v45 }
 0x241   : > { %2380 = vrcp.f32 %v1219_v1 }
 0x242   : > { %2166 = vmatmul.msk.f32.vlgmr.msra.gmra.mxu3 %vm979_vm2, %v1070_v2 }
 0x243   : > { %1265 = vmatpush.msra.mxu3 %v752_v28  ;;  %v766_v28 = vld [vmem:[#allocation13 + $0x68] sm:$0xff] }
 0x245   : > { %1266 = vmatpush.msra.mxu3 %v751_v29  ;;  %v771_v29 = vld [vmem:[#allocation14 + $0x10] sm:$0xff] }
 0x247   : > { %v2381_v3 = vpop.eup %2380  ;;  %1267 = vmatpush.msra.mxu3 %v750_v30  ;;  %v765_v30 = vld [vmem:[#allocation13 + $0x60] sm:$0xff] }
 0x248   : > { %v1221_v4 = vmul.f32 %v2381_v3, %v2377_v52 }
 0x249   : > { %1268 = vmatpush.msra.mxu3 %v749_v31  ;;  %v770_v31 = vld [vmem:[#allocation14 + $0x8] sm:$0xff] }
 0x24a   : > { %2168 = vmatmul.msk.f32.vlgmr.msrb.gmra.mxu3 %vm950_vm0, %v1099_v19  ;;  %2172 = vmatmul.msk.f32.vlgmr.msra.gmra.mxu2 %vm979_vm2, %v1221_v4 }
 0x24b   : > { %1269 = vmatpush.msra.mxu3 %v748_v32  ;;  %v764_v32 = vld [vmem:[#allocation13 + $0x58] sm:$0xff] }
 0x24d   : > { %1270 = vmatpush.msra.mxu3 %v747_v33  ;;  %v769_v33 = vld [vmem:[#allocation14] sm:$0xff] }
 0x24e   : > { %v3245_v5 = vpop.f32.mrf.mxu2 }
 0x24f   : > { %1271 = vmatpush.msra.mxu3 %v746_v34  ;;  %v3271_v34 = vld [vmem:[%s578_s28] sm:$0xff] }
 0x251   : > { %1272 = vmatpush.msra.mxu3 %v745_v35  ;;  %v763_v35 = vld [vmem:[#allocation13 + $0x50] sm:$0xff] }
 0x253   : > { %1273 = vmatpush.msra.mxu3 %v744_v36  ;;  %v762_v36 = vld [vmem:[#allocation13 + $0x48] sm:$0xff] }
 0x255   : > { %1274 = vmatpush.msra.mxu3 %v743_v37 }
 0x257   : > { %1275 = vmatpush.msra.mxu3 %v742_v38  ;;  %v761_v38 = vld [vmem:[#allocation13 + $0x40] sm:$0xff] }
 0x259   : > { %1276 = vmatpush.msra.mxu3 %v741_v39  ;;  %v760_v39 = vld [vmem:[#allocation13 + $0x38] sm:$0xff] }
 0x25b   : > { %1277 = vmatpush.msra.mxu3 %v740_v40  ;;  %v759_v40 = vld [vmem:[#allocation13 + $0x30] sm:$0xff] }
 0x25d   : > { %1278 = vmatpush.msra.mxu3 %v739_v41 }
 0x25f   : > { %1279 = vmatpush.msra.mxu3 %v738_v42  ;;  %v758_v42 = vld [vmem:[#allocation13 + $0x28] sm:$0xff] }
 0x261   : > { %1280 = vmatpush.msra.mxu3 %v737_v44  ;;  %v757_v44 = vld [vmem:[#allocation13 + $0x20] sm:$0xff] }
 0x2c5   : > { %v1095_v6 = vpop.f32.mrf.mxu3 }
 0x2c6   : > { %1249 = vrot.lane.b32.xlu0 %v1095_v6, %s2880_s13 }
 0x2cd   : > { %v1123_v7 = vpop.f32.mrf.mxu3  ;;  %v1245_v8 = vpop.f32.mrf.mxu2 }
 0x2ce   : > { %v1126_v9 = vmul.f32 0.17677669, %v1123_v7  ;;  %1257 = vrot.lane.b32.xlu2 %v1245_v8, %s2881_s22 }
 0x2d0   : > { %v1127_v10 = vsel %vm949_vm1, %v1126_v9, -1e+30 }
 0x2d1   : > { %v1128_v11 = vsel %vm979_vm2, %v1127_v10, -inf }
 0x2d2   : > { %v1129_v12 = vrot.slane %v1128_v11, 4 }
 0x2d4   : > { %v1130_v13 = vmax.f32 %v1128_v11, %v1129_v12 }
 0x2d6   : > { %v1131_v14 = vrot.slane %v1130_v13, 2 }
 0x2d8   : > { %v1132_v15 = vmax.f32 %v1130_v13, %v1131_v14 }
 0x2da   : > { %v1133_v16 = vrot.slane %v1132_v15, 1 }
 0x2dc   : > { %v1134_v17 = vmax.f32 %v1132_v15, %v1133_v16  ;;  %v784_v15 = vld [vmem:[#allocation14 + $0x78] sm:$0xff]  ;;  %v783_v16 = vld [vmem:[#allocation14 + $0x70] sm:$0xff] }
 0x2dd   : > { %1359 = vmatpush.msrb.mxu1 %v784_v15 }
 0x2de   : > { %v1135_v18 = vsub.f32 %v1127_v10, %v1134_v17  ;;  %v782_v17 = vld [vmem:[#allocation14 + $0x68] sm:$0xff] }
 0x2df   : > { %1360 = vmatpush.msrb.mxu1 %v783_v16 }
 0x2e0   : > { %v1136_v19 = vmul.f32 1.442695, %v1135_v18  ;;  %v781_v18 = vld [vmem:[#allocation14 + $0x60] sm:$0xff] }
 0x2e1   : > { %1361 = vmatpush.msrb.mxu1 %v782_v17 }
 0x2e2   : > { %2382 = vpow2.f32 %v1136_v19  ;;  %v780_v19 = vld [vmem:[#allocation14 + $0x58] sm:$0xff] }
 0x2e3   : > { %1362 = vmatpush.msrb.mxu1 %v781_v18 }
 0x2e5   : > { %1363 = vmatpush.msrb.mxu1 %v780_v19 }
 0x2e8   : > { %v2383_v20 = vpop.eup %2382 }
 0x2e9   : > { %v1138_v21 = vsel %vm979_vm2, %v2383_v20, 0.0 }
 0x2ea   : > { %v1139_v22 = vrot.slane %v1138_v21, 4 }
 0x2ec   : > { %v1140_v23 = vadd.f32 %v1139_v22, %v1138_v21  ;;  %v778_v21 = vld [vmem:[#allocation14 + $0x48] sm:$0xff]  ;;  %v777_v22 = vld [vmem:[#allocation14 + $0x40] sm:$0xff] }
 0x2ee   : > { %v1141_v24 = vrot.slane %v1140_v23, 2 }
 0x2f0   : > { %v1142_v25 = vadd.f32 %v1141_v24, %v1140_v23  ;;  %v776_v23 = vld [vmem:[#allocation14 + $0x38] sm:$0xff]  ;;  %v775_v24 = vld [vmem:[#allocation14 + $0x30] sm:$0xff] }
 0x2f2   : > { %v1143_v57 = vrot.slane %v1142_v25, 1 }
 0x2f4   : > { %v1144_v58 = vadd.f32 %v1143_v57, %v1142_v25  ;;  %v774_v25 = vld [vmem:[#allocation14 + $0x28] sm:$0xff]  ;;  %v773_v57 = vld [vmem:[#allocation14 + $0x20] sm:$0xff] }
 0x2f6   : > { %2384 = vrcp.f32 %v1144_v58  ;;  %v768_v58 = vld [vmem:[#allocation13 + $0x78] sm:$0xff] }
 0x2f7   : > { %2386 = vrcp.f32 %v2883_v54  ;;  %1339 = vmatpush.msrb.mxu0 %v768_v58  ;;  %v753_v54 = vld [vmem:[#allocation13] sm:$0xff] }
 0x2fc   : > { %v2385_v26 = vpop.eup %2384 }
 0x2fd   : > { %v1146_v27 = vmul.f32 %v2385_v26, %v2383_v20  ;;  %v2387_v55 = vpop.eup %2386  ;;  %v779_v20 = vld [vmem:[#allocation14 + $0x50] sm:$0xff] }
 0x2fe   : > { %v1295_v56 = vmul.f32 1024.0, %v2387_v55  ;;  %vm1299_vm5 = vweird.f32 %v2387_v55  ;;  %1364 = vmatpush.msrb.mxu1 %v779_v20  ;;  %v767_v26 = vld [vmem:[#allocation13 + $0x70] sm:$0xff] }
 0x2ff   : > { %2169 = vmatmul.msk.f32.vlgmr.msra.gmra.mxu0 %vm979_vm2, %v1146_v27  ;;  %v772_v27 = vld [vmem:[#allocation14 + $0x18] sm:$0xff] }
 0x300   : > { %v1296_v59 = vsub.f32 1.0, %v1295_v56  ;;  %1365 = vmatpush.msrb.mxu1 %v778_v21  ;;  %1340 = vmatpush.msrb.mxu0 %v767_v26 }
 0x302   : > { %v1297_v63 = vmul.f32 %v2387_v55, %v1296_v59  ;;  %1366 = vmatpush.msrb.mxu1 %v777_v22  ;;  %1341 = vmatpush.msrb.mxu0 %v766_v28  ;;  %v800_v59 = vld [vmem:[#allocation16 + $0x78] sm:$0xff] }
 0x303   : > { %1379 = vmatpush.msrb.mxu2 %v800_v59 }
 0x304   : > { %v1298_v2 = vadd.f32 %v2387_v55, %v1297_v63  ;;  %1367 = vmatpush.msrb.mxu1 %v776_v23  ;;  %1342 = vmatpush.msrb.mxu0 %v765_v30  ;;  %v796_v63 = vld [vmem:[#allocation16 + $0x58] sm:$0xff] }
 0x306   : > { %1368 = vmatpush.msrb.mxu1 %v775_v24  ;;  %1343 = vmatpush.msrb.mxu0 %v764_v32 }
 0x308   : > { %1369 = vmatpush.msrb.mxu1 %v774_v25  ;;  %1344 = vmatpush.msrb.mxu0 %v763_v35 }
 0x30a   : > { %1370 = vmatpush.msrb.mxu1 %v773_v57  ;;  %1345 = vmatpush.msrb.mxu0 %v762_v36 }
 0x30c   : > { %1371 = vmatpush.msrb.mxu1 %v772_v27  ;;  %1346 = vmatpush.msrb.mxu0 %v761_v38 }
 0x30e   : > { %1372 = vmatpush.msrb.mxu1 %v771_v29  ;;  %1347 = vmatpush.msrb.mxu0 %v760_v39 }
 0x310   : > { %1373 = vmatpush.msrb.mxu1 %v770_v31  ;;  %1348 = vmatpush.msrb.mxu0 %v759_v40 }
 0x312   : > { %1374 = vmatpush.msrb.mxu1 %v769_v33  ;;  %1349 = vmatpush.msrb.mxu0 %v758_v42 }
 0x313   : > { %1375 = vmatmul.f32.vlgmr.msrb.gmra.mxu1 %v3271_v34 }
 0x314   : > { %1350 = vmatpush.msrb.mxu0 %v757_v44 }
 0x328   : > { %v1258_v49 = vpop.permute.xlu2 %1257 }
 0x338   : > { %v1250_v45 = vpop.permute.xlu0 %1249 }
 0x339   : > { %v1260_v46 = vsel %vm950_vm0, %v3245_v5, %v1250_v45  ;;  %v1300_v5 = vsel %vm1299_vm5, %v2387_v55, %v1298_v2 }
 0x37c   : > { %v1170_v43 = vpop.f32.mrf.mxu0 }
 0x37d   : > { %1253 = vrot.lane.b32.xlu1 %v1170_v43, %s2882_s25 }
 0x390   : > { %v1376_v2 = vpop.f32.mrf.mxu1 }
 0x391   : > { %1470 = vrot.lane.b32.xlu2 %v1376_v2, %s2881_s22  ;;  %2173 = vmatpush.xpose.msk.msrb.mxu3 %vm950_vm0, %v1376_v2 }
 0x399   : > { %1545 = vrot.lane.b32.xlu2 %v1376_v2, %s2882_s25 }
 0x3a1   : > { %1619 = vrot.lane.b32.xlu2 %v1376_v2, %s2880_s13 }
 0x3ef   : > { %v1254_v48 = vpop.permute.xlu1 %1253 }
 0x3f0   : > { %v1262_v50 = vsel %vm1261_vm3, %v1260_v46, %v1254_v48  ;;  %v756_v46 = vld [vmem:[#allocation13 + $0x18] sm:$0xff] }
 0x3f1   : > { %v1264_v51 = vsel %vm1263_vm4, %v1262_v50, %v1258_v49  ;;  %v755_v49 = vld [vmem:[#allocation13 + $0x10] sm:$0xff]  ;;  %1351 = vmatpush.msrb.mxu0 %v756_v46 }
 0x3f2   : > { %1281 = vmatmul.f32.vlgmr.msra.gmra.mxu3 %v1264_v51 }
 0x3f3   : > { %1352 = vmatpush.msrb.mxu0 %v755_v49 }
 0x475   : > { %v1282_v52 = vpop.f32.mrf.mxu3 }
 0x476   : > { %v1283_v53 = vadd.f32 %v1282_v52, %v3199_v47 }
 0x478   : > { %1285 = vadd.xlane.f32.xlu0 %v1283_v53 }
 0x4eb   : > { %v1286_v60 = vpop.xlane.xlu0 %1285 }
 0x4ec   : > { %v1287_v61 = vrot.slane %v1286_v60, 4 }
 0x4ee   : > { %v1288_v62 = vadd.f32 %v1287_v61, %v1286_v60  ;;  %v799_v60 = vld [vmem:[#allocation16 + $0x70] sm:$0xff]  ;;  %v798_v61 = vld [vmem:[#allocation16 + $0x68] sm:$0xff] }
 0x4ef   : > { %1380 = vmatpush.msrb.mxu2 %v799_v60 }
 0x4f0   : > { %v1289_v0 = vrot.slane %v1288_v62, 2 }
 0x4f1   : > { %1381 = vmatpush.msrb.mxu2 %v798_v61 }
 0x4f2   : > { %v1290_v1 = vadd.f32 %v1289_v0, %v1288_v62  ;;  %v797_v62 = vld [vmem:[#allocation16 + $0x60] sm:$0xff]  ;;  %v795_v0 = vld [vmem:[#allocation16 + $0x50] sm:$0xff] }
 0x4f3   : > { %1382 = vmatpush.msrb.mxu2 %v797_v62 }
 0x4f4   : > { %v1291_v3 = vrot.slane %v1290_v1, 1 }
 0x4f5   : > { %1383 = vmatpush.msrb.mxu2 %v796_v63 }
 0x4f6   : > { %v1292_v4 = vadd.f32 %v1291_v3, %v1290_v1  ;;  %v794_v1 = vld [vmem:[#allocation16 + $0x48] sm:$0xff]  ;;  %v793_v3 = vld [vmem:[#allocation16 + $0x40] sm:$0xff] }
 0x4f7   : > { %1384 = vmatpush.msrb.mxu2 %v795_v0 }
 0x4f8   : > { %2189 = vpush %v1292_v4  ;;  %v792_v4 = vld [vmem:[#allocation16 + $0x38] sm:$0xff] }
 0x4f9   : > { %2191 = vpush %v1300_v5  ;;  %1385 = vmatpush.msrb.mxu2 %v794_v1  ;;  %v791_v5 = vld [vmem:[#allocation16 + $0x30] sm:$0xff] }
 0x4fb   : > { %1386 = vmatpush.msrb.mxu2 %v793_v3 }
 0x4fd   : > { %1387 = vmatpush.msrb.mxu2 %v792_v4 }
 0x4ff   : > { %1388 = vmatpush.msrb.mxu2 %v791_v5 }
 0x529   : > { %s2190_s7 = spop %2189 }
 0x52a   : > { %s3261_s14 = spop %2191 }
 0x52b   : > { %s1302_s2 = smul.f32 %s3261_s14, %s2190_s7 }
 0x52d   : > { %v1303_v47 = vstv %s1302_s2 }
 0x52e   : > { %v3264_v6 = vsub.f32 %v1283_v53, %v1303_v47  ;;  %v754_v53 = vld [vmem:[#allocation13 + $0x8] sm:$0xff] }
 0x52f   : > { %1353 = vmatpush.msrb.mxu0 %v754_v53  ;;  %v790_v47 = vld [vmem:[#allocation16 + $0x28] sm:$0xff] }
 0x530   : > { %v1305_v7 = vmul.f32 %v3264_v6, %v3264_v6  ;;  %1389 = vmatpush.msrb.mxu2 %v790_v47 }
 0x531   : > { %1354 = vmatpush.msrb.mxu0 %v753_v54 }
 0x532   : > { %1306 = vadd.xlane.f32.xlu1 %v1305_v7  ;;  %v788_v7 = vld [vmem:[#allocation16 + $0x18] sm:$0xff] }
 0x5a5   : > { %v1307_v8 = vpop.xlane.xlu1 %1306 }
 0x5a6   : > { %v1308_v9 = vrot.slane %v1307_v8, 4 }
 0x5a8   : > { %v1309_v10 = vadd.f32 %v1308_v9, %v1307_v8  ;;  %v787_v8 = vld [vmem:[#allocation16 + $0x10] sm:$0xff]  ;;  %v786_v9 = vld [vmem:[#allocation16 + $0x8] sm:$0xff] }
 0x5aa   : > { %v1310_v11 = vrot.slane %v1309_v10, 2 }
 0x5ac   : > { %v1311_v12 = vadd.f32 %v1310_v11, %v1309_v10  ;;  %v785_v10 = vld [vmem:[#allocation16] sm:$0xff] }
 0x5ae   : > { %v1312_v13 = vrot.slane %v1311_v12, 1 }
 0x5b0   : > { %v1313_v14 = vadd.f32 %v1312_v13, %v1311_v12  ;;  %v1471_v12 = vpop.permute.xlu2 %1470 }
 0x5b1   : > { %2176 = vmatpush.xpose.msk.msra.mxu1 %vm950_vm0, %v1471_v12 }
 0x5b2   : > { %2193 = vpush %v1313_v14 }
 0x5b8   : > { %v1546_v13 = vpop.permute.xlu2 %1545 }
 0x5b9   : > { %2179 = vmatpush.xpose.msk.msra.mxu3 %vm950_vm0, %v1546_v13 }
 0x5c0   : > { %v1620_v14 = vpop.permute.xlu2 %1619 }
 0x5c1   : > { %2182 = vmatpush.xpose.msk.msrb.mxu1 %vm950_vm0, %v1620_v14 }
 0x5e3   : > { %s2194_s27 = spop %2193 }
 0x5e4   : > { %s1323_s3 = smul.f32 %s2194_s27, %s3261_s14 }
 0x5e6   : > { %s1324_s18 = sadd.f32 1e-05, %s1323_s3 }
 0x5e8   : > { %v1325_v37 = vstv %s1324_s18 }
 0x5e9   : > { %2388 = vrsqrt.f32 %v1325_v37  ;;  %vm1332_vm7 = vweird.f32 %v1325_v37 }
 0x5ef   : > { %v2389_v41 = vpop.eup %2388 }
 0x5f0   : > { %v1327_v43 = vmul.f32 %v2389_v41, %v1325_v37  ;;  %vm1333_vm6 = vweird.f32 %v2389_v41 }
 0x5f1   : > { %vm1334_vm8 = vmor %vm1332_vm7, %vm1333_vm6 }
 0x5f2   : > { %v1328_v45 = vmul.f32 %v2389_v41, %v1327_v43 }
 0x5f4   : > { %v1329_v48 = vmul.f32 0.5, %v1328_v45 }
 0x5f6   : > { %v1330_v50 = vsub.f32 1.5, %v1329_v48 }
 0x5f8   : > { %v1331_v51 = vmul.f32 %v2389_v41, %v1330_v50 }
 0x5fa   : > { %v1335_v52 = vsel %vm1334_vm8, %v2389_v41, %v1331_v51 }
 0x5fb   : > { %2195 = vpush %v1335_v52 }
 0x62c   : > { %s2196_s24 = spop %2195 }
 0x62d   : > { %v1337_v55 = vstv %s2196_s24  ;;  %s2186_s24 = sshll.u32 %s2983_s20, 3 }
 0x62e   : > { %v3275_v56 = vmul.f32 %v1337_v55, %v3264_v6  ;;  %v789_v6 = vld [vmem:[#allocation16 + $0x20] sm:$0xff] }
 0x62f   : > { %1390 = vmatpush.msrb.mxu2 %v789_v6 }
 0x630   : > { %1355 = vmatmul.f32.vlgmr.msrb.gmra.mxu0 %v3275_v56 }
 0x631   : > { %1391 = vmatpush.msrb.mxu2 %v788_v7 }
 0x633   : > { %1392 = vmatpush.msrb.mxu2 %v787_v8 }
 0x635   : > { %1393 = vmatpush.msrb.mxu2 %v786_v9 }
 0x637   : > { %1394 = vmatpush.msrb.mxu2 %v785_v10 }
 0x638   : > { %1395 = vmatmul.f32.vlgmr.msrb.gmra.mxu2 %v3271_v34 }
 0x6ad   : > { %v1356_v11 = vpop.f32.mrf.mxu0 }
 0x6ae   : > { %1468 = vrot.lane.b32.xlu2 %v1356_v11, %s2881_s22  ;;  %2174 = vmatmul.msk.f32.vlgmr.msrb.gmra.mxu3 %vm950_vm0, %v1356_v11 }
 0x6b6   : > { %1543 = vrot.lane.b32.xlu2 %v1356_v11, %s2882_s25 }
 0x6bb   : > { %v1396_v18 = vpop.f32.mrf.mxu2 }
 0x6bc   : > { %1517 = vrot.lane.b32.xlu0 %v1396_v18, %s2881_s22  ;;  %1665 = vrot.lane.b32.xlu1 %v1396_v18, %s2880_s13 }
 0x6bd   : > { %1463 = vmatpush.msra.mxu0 %v1396_v18 }
 0x6be   : > { %1617 = vrot.lane.b32.xlu2 %v1356_v11, %s2880_s13 }
 0x6c6   : > { %1591 = vrot.lane.b32.xlu2 %v1396_v18, %s2882_s25 }
 0x708   : > { %v1469_v15 = vpop.permute.xlu2 %1468 }
 0x709   : > { %2177 = vmatmul.msk.f32.vlgmr.msra.gmra.mxu1 %vm950_vm0, %v1469_v15 }
 0x710   : > { %v1544_v16 = vpop.permute.xlu2 %1543 }
 0x711   : > { %2180 = vmatmul.msk.f32.vlgmr.msra.gmra.mxu3 %vm950_vm0, %v1544_v16 }
 0x718   : > { %v1618_v17 = vpop.permute.xlu2 %1617 }
 0x719   : > { %2183 = vmatmul.msk.f32.vlgmr.msrb.gmra.mxu1 %vm950_vm0, %v1618_v17 }
 0x720   : > { %v1592_v53 = vpop.permute.xlu2 %1591 }
 0x721   : > { %1612 = vmatpush.msrb.mxu0 %v1592_v53  ;;  %v809_v53 = vld [vmem:[#allocation17 + $0x40] sm:$0xff] }
 0x72e   : > { %v1518_v50 = vpop.permute.xlu0 %1517  ;;  %v1666_v13 = vpop.permute.xlu1 %1665 }
 0x72f   : > { %1538 = vmatpush.msra.mxu2 %v1518_v50  ;;  %v812_v50 = vld [vmem:[#allocation17 + $0x58] sm:$0xff] }
 0x731   : > { %v1422_v19 = vpop.f32.mrf.mxu3  ;;  %1686 = vmatpush.msrb.mxu2 %v1666_v13 }
 0x732   : > { %v1425_v20 = vmul.f32 0.17677669, %v1422_v19 }
 0x734   : > { %v1426_v21 = vsel %vm979_vm2, %v1425_v20, -inf }
 0x735   : > { %v1427_v22 = vrot.slane %v1426_v21, 4 }
 0x737   : > { %v1428_v23 = vmax.f32 %v1426_v21, %v1427_v22 }
 0x739   : > { %v1429_v24 = vrot.slane %v1428_v23, 2 }
 0x73b   : > { %v1430_v25 = vmax.f32 %v1428_v23, %v1429_v24 }
 0x73d   : > { %v1431_v57 = vrot.slane %v1430_v25, 1 }
 0x73f   : > { %v1432_v58 = vmax.f32 %v1430_v25, %v1431_v57 }
 0x741   : > { %v1433_v26 = vsub.f32 %v1425_v20, %v1432_v58 }
 0x743   : > { %v1434_v27 = vmul.f32 1.442695, %v1433_v26 }
 0x745   : > { %2390 = vpow2.f32 %v1434_v27 }
 0x74b   : > { %v2391_v28 = vpop.eup %2390 }
 0x74c   : > { %v1436_v29 = vsel %vm979_vm2, %v2391_v28, 0.0 }
 0x74d   : > { %v1437_v30 = vrot.slane %v1436_v29, 4 }
 0x74f   : > { %v1438_v31 = vadd.f32 %v1437_v30, %v1436_v29 }
 0x751   : > { %v1439_v32 = vrot.slane %v1438_v31, 2 }
 0x753   : > { %v1440_v33 = vadd.f32 %v1439_v32, %v1438_v31 }
 0x755   : > { %v1441_v34 = vrot.slane %v1440_v33, 1 }
 0x757   : > { %v1442_v35 = vadd.f32 %v1441_v34, %v1440_v33 }
 0x759   : > { %2392 = vrcp.f32 %v1442_v35 }
 0x75f   : > { %v2393_v36 = vpop.eup %2392 }
 0x760   : > { %v1444_v37 = vmul.f32 %v2393_v36, %v2391_v28 }
 0x762   : > { %2175 = vmatmul.msk.f32.vlgmr.msra.gmra.mxu0 %vm979_vm2, %v1444_v37 }
 0x786   : > { %v1493_v38 = vpop.f32.mrf.mxu1 }
 0x787   : > { %v1496_v39 = vmul.f32 0.17677669, %v1493_v38 }
 0x789   : > { %v1497_v40 = vsel %vm979_vm2, %v1496_v39, -inf }
 0x78a   : > { %v1498_v41 = vrot.slane %v1497_v40, 4 }
 0x78c   : > { %v1499_v42 = vmax.f32 %v1497_v40, %v1498_v41 }
 0x78e   : > { %v1500_v43 = vrot.slane %v1499_v42, 2 }
 0x790   : > { %v1501_v44 = vmax.f32 %v1499_v42, %v1500_v43 }
 0x792   : > { %v1502_v45 = vrot.slane %v1501_v44, 1 }
 0x794   : > { %v1503_v46 = vmax.f32 %v1501_v44, %v1502_v45  ;;  %v1568_v48 = vpop.f32.mrf.mxu3  ;;  %v816_v45 = vld [vmem:[#allocation17 + $0x78] sm:$0xff] }
 0x795   : > { %v1571_v49 = vmul.f32 0.17677669, %v1568_v48  ;;  %1706 = vmatpush.msrb.mxu3 %v816_v45  ;;  %v814_v48 = vld [vmem:[#allocation17 + $0x68] sm:$0xff] }
 0x796   : > { %v1504_v51 = vsub.f32 %v1496_v39, %v1503_v46  ;;  %v1642_v52 = vpop.f32.mrf.mxu1  ;;  %v815_v46 = vld [vmem:[#allocation17 + $0x70] sm:$0xff] }
 0x797   : > { %v1572_v54 = vsel %vm979_vm2, %v1571_v49, -inf  ;;  %v1645_v55 = vmul.f32 0.17677669, %v1642_v52  ;;  %1707 = vmatpush.msrb.mxu3 %v815_v46  ;;  %v810_v52 = vld [vmem:[#allocation17 + $0x48] sm:$0xff]  ;;  %v825_v46 = vld [vmem:[#allocation19 + $0x40] sm:$0xff] }
 0x798   : > { %v1505_v59 = vmul.f32 1.442695, %v1504_v51  ;;  %v1573_v60 = vrot.slane %v1572_v54, 4  ;;  %v811_v51 = vld [vmem:[#allocation17 + $0x50] sm:$0xff] }
 0x799   : > { %v1646_v61 = vsel %vm979_vm2, %v1645_v55, -inf  ;;  %1708 = vmatpush.msrb.mxu3 %v814_v48  ;;  %v826_v48 = vld [vmem:[#allocation19 + $0x48] sm:$0xff] }
 0x79a   : > { %2394 = vpow2.f32 %v1505_v59  ;;  %v1574_v62 = vmax.f32 %v1572_v54, %v1573_v60  ;;  %v1647_v63 = vrot.slane %v1646_v61, 4  ;;  %v808_v54 = vld [vmem:[#allocation17 + $0x38] sm:$0xff]  ;;  %v806_v59 = vld [vmem:[#allocation17 + $0x28] sm:$0xff]  ;;  %v805_v60 = vld [vmem:[#allocation17 + $0x20] sm:$0xff] }
 0x79c   : > { %v1575_v0 = vrot.slane %v1574_v62, 2  ;;  %v1648_v1 = vmax.f32 %v1646_v61, %v1647_v63  ;;  %v804_v61 = vld [vmem:[#allocation17 + $0x18] sm:$0xff]  ;;  %v802_v63 = vld [vmem:[#allocation17 + $0x8] sm:$0xff] }
 0x79e   : > { %v1576_v2 = vmax.f32 %v1574_v62, %v1575_v0  ;;  %v1649_v3 = vrot.slane %v1648_v1, 2  ;;  %v803_v62 = vld [vmem:[#allocation17 + $0x10] sm:$0xff]  ;;  %v801_v0 = vld [vmem:[#allocation17] sm:$0xff] }
 0x7a0   : > { %v2395_v4 = vpop.eup %2394  ;;  %v1577_v5 = vrot.slane %v1576_v2, 1  ;;  %v1650_v47 = vmax.f32 %v1648_v1, %v1649_v3 }
 0x7a1   : > { %v1507_v6 = vsel %vm979_vm2, %v2395_v4, 0.0 }
 0x7a2   : > { %v1508_v7 = vrot.slane %v1507_v6, 4  ;;  %v1578_v8 = vmax.f32 %v1576_v2, %v1577_v5  ;;  %v1651_v9 = vrot.slane %v1650_v47, 1 }
 0x7a4   : > { %v1509_v10 = vadd.f32 %v1508_v7, %v1507_v6  ;;  %v1579_v11 = vsub.f32 %v1571_v49, %v1578_v8  ;;  %v1652_v12 = vmax.f32 %v1650_v47, %v1651_v9  ;;  %v813_v49 = vld [vmem:[#allocation17 + $0x60] sm:$0xff] }
 0x7a5   : > { %1709 = vmatpush.msrb.mxu3 %v813_v49 }
 0x7a6   : > { %v1510_v14 = vrot.slane %v1509_v10, 2  ;;  %v1580_v15 = vmul.f32 1.442695, %v1579_v11  ;;  %v1653_v16 = vsub.f32 %v1645_v55, %v1652_v12  ;;  %v807_v55 = vld [vmem:[#allocation17 + $0x30] sm:$0xff] }
 0x7a7   : > { %1710 = vmatpush.msrb.mxu3 %v812_v50  ;;  %v823_v50 = vld [vmem:[#allocation19 + $0x30] sm:$0xff] }
 0x7a8   : > { %v1511_v17 = vadd.f32 %v1510_v14, %v1509_v10  ;;  %2396 = vpow2.f32 %v1580_v15  ;;  %v1654_v18 = vmul.f32 1.442695, %v1653_v16 }
 0x7a9   : > { %1711 = vmatpush.msrb.mxu3 %v811_v51  ;;  %v824_v51 = vld [vmem:[#allocation19 + $0x38] sm:$0xff] }
 0x7aa   : > { %v1512_v19 = vrot.slane %v1511_v17, 1  ;;  %2398 = vpow2.f32 %v1654_v18 }
 0x7ab   : > { %1712 = vmatpush.msrb.mxu3 %v810_v52 }
 0x7ac   : > { %v1513_v20 = vadd.f32 %v1512_v19, %v1511_v17 }
 0x7ad   : > { %1713 = vmatpush.msrb.mxu3 %v809_v53  ;;  %v821_v53 = vld [vmem:[#allocation19 + $0x20] sm:$0xff] }
 0x7ae   : > { %v2397_v21 = vpop.eup %2396  ;;  %2400 = vrcp.f32 %v1513_v20 }
 0x7af   : > { %v1582_v22 = vsel %vm979_vm2, %v2397_v21, 0.0  ;;  %1714 = vmatpush.msrb.mxu3 %v808_v54  ;;  %v822_v54 = vld [vmem:[#allocation19 + $0x28] sm:$0xff] }
 0x7b0   : > { %v2399_v23 = vpop.eup %2398  ;;  %v1583_v24 = vrot.slane %v1582_v22, 4 }
 0x7b1   : > { %v1656_v25 = vsel %vm979_vm2, %v2399_v23, 0.0  ;;  %1715 = vmatpush.msrb.mxu3 %v807_v55 }
 0x7b2   : > { %v1584_v57 = vadd.f32 %v1583_v24, %v1582_v22  ;;  %v1657_v58 = vrot.slane %v1656_v25, 4  ;;  %v847_v24 = vld [vmem:[#allocation19 + $0xf0] sm:$0xff] }
 0x7b3   : > { %1716 = vmatpush.msrb.mxu3 %v806_v59  ;;  %1785 = vmatpush.msra.mxu0 %v847_v24  ;;  %v870_v24 = vld [vmem:[#allocation20 + $0xa0] sm:$0xff] }
 0x7b4   : > { %v2401_v26 = vpop.eup %2400  ;;  %v1585_v27 = vrot.slane %v1584_v57, 2  ;;  %v1658_v28 = vadd.f32 %v1657_v58, %v1656_v25  ;;  %v848_v25 = vld [vmem:[#allocation19 + $0xf8] sm:$0xff]  ;;  %v846_v58 = vld [vmem:[#allocation19 + $0xe8] sm:$0xff] }
 0x7b5   : > { %v1515_v29 = vmul.f32 %v2401_v26, %v2395_v4  ;;  %1717 = vmatpush.msrb.mxu3 %v805_v60  ;;  %1805 = vmatpush.msra.mxu1 %v848_v25  ;;  %v843_v26 = vld [vmem:[#allocation19 + $0xd0] sm:$0xff]  ;;  %v853_v25 = vld [vmem:[#allocation20 + $0x18] sm:$0xff] }
 0x7b6   : > { %v1586_v30 = vadd.f32 %v1585_v27, %v1584_v57  ;;  %v1659_v31 = vrot.slane %v1658_v28, 2  ;;  %v845_v57 = vld [vmem:[#allocation19 + $0xe0] sm:$0xff]  ;;  %v844_v27 = vld [vmem:[#allocation19 + $0xd8] sm:$0xff] }
 0x7b7   : > { %2178 = vmatmul.msk.f32.vlgmr.msra.gmra.mxu2 %vm979_vm2, %v1515_v29  ;;  %1718 = vmatpush.msrb.mxu3 %v804_v61  ;;  %v842_v29 = vld [vmem:[#allocation19 + $0xc8] sm:$0xff] }
 0x7b8   : > { %v1587_v32 = vrot.slane %v1586_v30, 1  ;;  %v1660_v33 = vadd.f32 %v1659_v31, %v1658_v28  ;;  %1786 = vmatpush.msra.mxu0 %v845_v57  ;;  %1806 = vmatpush.msra.mxu1 %v846_v58  ;;  %v841_v28 = vld [vmem:[#allocation19 + $0xc0] sm:$0xff]  ;;  %v840_v31 = vld [vmem:[#allocation19 + $0xb8] sm:$0xff] }
 0x7b9   : > { %1719 = vmatpush.msrb.mxu3 %v803_v62  ;;  %v819_v62 = vld [vmem:[#allocation19 + $0x10] sm:$0xff]  ;;  %v869_v57 = vld [vmem:[#allocation20 + $0x98] sm:$0xff] }
 0x7ba   : > { %v1588_v34 = vadd.f32 %v1587_v32, %v1586_v30  ;;  %v1661_v35 = vrot.slane %v1660_v33, 1  ;;  %1787 = vmatpush.msra.mxu0 %v843_v26  ;;  %1807 = vmatpush.msra.mxu1 %v844_v27  ;;  %v839_v30 = vld [vmem:[#allocation19 + $0xb0] sm:$0xff]  ;;  %v837_v32 = vld [vmem:[#allocation19 + $0xa0] sm:$0xff] }
 0x7bb   : > { %1720 = vmatpush.msrb.mxu3 %v802_v63  ;;  %v820_v63 = vld [vmem:[#allocation19 + $0x18] sm:$0xff]  ;;  %v852_v27 = vld [vmem:[#allocation20 + $0x10] sm:$0xff] }
 0x7bc   : > { %2402 = vrcp.f32 %v1588_v34  ;;  %v1662_v36 = vadd.f32 %v1661_v35, %v1660_v33  ;;  %1788 = vmatpush.msra.mxu0 %v841_v28  ;;  %1808 = vmatpush.msra.mxu1 %v842_v29  ;;  %v838_v33 = vld [vmem:[#allocation19 + $0xa8] sm:$0xff]  ;;  %v835_v34 = vld [vmem:[#allocation19 + $0x90] sm:$0xff]  ;;  %v836_v35 = vld [vmem:[#allocation19 + $0x98] sm:$0xff] }
 0x7bd   : > { %1721 = vmatpush.msrb.mxu3 %v801_v0  ;;  %v817_v0 = vld [vmem:[#allocation19] sm:$0xff]  ;;  %v868_v28 = vld [vmem:[#allocation20 + $0x90] sm:$0xff]  ;;  %v851_v29 = vld [vmem:[#allocation20 + $0x8] sm:$0xff] }
 0x7be   : > { %2404 = vrcp.f32 %v1662_v36  ;;  %1789 = vmatpush.msra.mxu0 %v839_v30  ;;  %1809 = vmatpush.msra.mxu1 %v840_v31  ;;  %v833_v36 = vld [vmem:[#allocation19 + $0x80] sm:$0xff]  ;;  %v867_v30 = vld [vmem:[#allocation20 + $0x88] sm:$0xff] }
 0x7bf   : > { %v850_v31 = vld [vmem:[#allocation20] sm:$0xff] }
 0x7c0   : > { %1790 = vmatpush.msra.mxu0 %v837_v32  ;;  %1810 = vmatpush.msra.mxu1 %v838_v33  ;;  %v866_v32 = vld [vmem:[#allocation20 + $0x80] sm:$0xff] }
 0x7c1   : > { %v849_v33 = vld [vmem:[%s3375_s11] sm:$0x3] }
 0x7c2   : > { %v2403_v37 = vpop.eup %2402  ;;  %1791 = vmatpush.msra.mxu0 %v835_v34  ;;  %1811 = vmatpush.msra.mxu1 %v836_v35  ;;  %v1781_v34 = vperm.slane %v849_v33, 0 }
 0x7c3   : > { %v1590_v38 = vmul.f32 %v2403_v37, %v2397_v21  ;;  %v834_v37 = vld [vmem:[#allocation19 + $0x88] sm:$0xff] }
 0x7c4   : > { %v2405_v39 = vpop.eup %2404  ;;  %1792 = vmatpush.msra.mxu0 %v833_v36  ;;  %1812 = vmatpush.msra.mxu1 %v834_v37 }
 0x7c5   : > { %v1664_v40 = vmul.f32 %v2405_v39, %v2399_v23  ;;  %2181 = vmatmul.msk.f32.vlgmr.msrb.gmra.mxu0 %vm979_vm2, %v1590_v38  ;;  %v831_v39 = vld [vmem:[#allocation19 + $0x70] sm:$0xff] }
 0x7c6   : > { %1793 = vmatpush.msra.mxu0 %v831_v39 }
 0x7c7   : > { %2184 = vmatmul.msk.f32.vlgmr.msrb.gmra.mxu2 %vm979_vm2, %v1664_v40  ;;  %v832_v40 = vld [vmem:[#allocation19 + $0x78] sm:$0xff] }
 0x7c8   : > { %1813 = vmatpush.msra.mxu1 %v832_v40 }
 0x7df   : > { %v1465_v41 = vpop.f32.mrf.mxu0 }
 0x83a   : > { %v1540_v42 = vpop.f32.mrf.mxu2 }
 0x83b   : > { %1692 = vrot.lane.b32.xlu2 %v1540_v42, %s2880_s13  ;;  %v830_v42 = vld [vmem:[#allocation19 + $0x68] sm:$0xff] }
 0x83c   : > { %1814 = vmatpush.msra.mxu1 %v830_v42 }
 0x842   : > { %v1614_v43 = vpop.f32.mrf.mxu0 }
 0x843   : > { %1696 = vrot.lane.b32.xlu0 %v1614_v43, %s2882_s25  ;;  %v827_v43 = vld [vmem:[#allocation19 + $0x50] sm:$0xff]  ;;  %s3410_s25 = sld [smem:[#allocation43_spill]] }
 0x84a   : > { %v1688_v44 = vpop.f32.mrf.mxu2 }
 0x84b   : > { %1700 = vrot.lane.b32.xlu2 %v1688_v44, %s2881_s22  ;;  %v828_v44 = vld [vmem:[#allocation19 + $0x58] sm:$0xff] }
 0x84c   : > { %1815 = vmatpush.msra.mxu1 %v828_v44 }
 0x84e   : > { %1816 = vmatpush.msra.mxu1 %v826_v48 }
 0x850   : > { %1817 = vmatpush.msra.mxu1 %v824_v51 }
 0x852   : > { %1818 = vmatpush.msra.mxu1 %v822_v54 }
 0x854   : > { %1819 = vmatpush.msra.mxu1 %v820_v63 }
 0x895   : > { %v1693_v1 = vpop.permute.xlu2 %1692 }
 0x896   : > { %v1703_v2 = vsel %vm950_vm0, %v1465_v41, %v1693_v1  ;;  %v829_v41 = vld [vmem:[#allocation19 + $0x60] sm:$0xff]  ;;  %v818_v1 = vld [vmem:[#allocation19 + $0x8] sm:$0xff] }
 0x897   : > { %1794 = vmatpush.msra.mxu0 %v829_v41  ;;  %1820 = vmatpush.msra.mxu1 %v818_v1  ;;  %v2369_v41 = vld [vmem:[%s3410_s25] ss:$0 sm:$0xff] }
 0x899   : > { %1795 = vmatpush.msra.mxu0 %v827_v43 }
 0x89b   : > { %1796 = vmatpush.msra.mxu0 %v825_v46 }
 0x89d   : > { %1797 = vmatpush.msra.mxu0 %v823_v50 }
 0x89f   : > { %1798 = vmatpush.msra.mxu0 %v821_v53 }
 0x8a1   : > { %1799 = vmatpush.msra.mxu0 %v819_v62 }
 0x8a3   : > { %1800 = vmatpush.msra.mxu0 %v817_v0 }
 0x8a5   : > { %v1701_v4 = vpop.permute.xlu2 %1700 }
 0x8b5   : > { %v1697_v3 = vpop.permute.xlu0 %1696 }
 0x8b6   : > { %v1704_v5 = vsel %vm1261_vm3, %v1703_v2, %v1697_v3  ;;  %v865_v2 = vld [vmem:[#allocation20 + $0x78] sm:$0xff] }
 0x8b7   : > { %v1705_v47 = vsel %vm1263_vm4, %v1704_v5, %v1701_v4  ;;  %v881_v3 = vld [vmem:[#allocation20 + $0xf8] sm:$0xff]  ;;  %v864_v4 = vld [vmem:[#allocation20 + $0x70] sm:$0xff]  ;;  %1830 = vmatpush.msra.mxu2 %v865_v2 }
 0x8b8   : > { %1722 = vmatmul.f32.vlgmr.msrb.gmra.mxu3 %v1705_v47  ;;  %v880_v5 = vld [vmem:[#allocation20 + $0xf0] sm:$0xff]  ;;  %v863_v47 = vld [vmem:[#allocation20 + $0x68] sm:$0xff] }
 0x8b9   : > { %1850 = vmatpush.msra.mxu3 %v881_v3  ;;  %1831 = vmatpush.msra.mxu2 %v864_v4 }
 0x8bb   : > { %1851 = vmatpush.msra.mxu3 %v880_v5  ;;  %1832 = vmatpush.msra.mxu2 %v863_v47 }
 0x93b   : > { %v1723_v6 = vpop.f32.mrf.mxu3 }
 0x93c   : > { %v1724_v7 = vadd.f32 %v1723_v6, %v3275_v56  ;;  %v879_v6 = vld [vmem:[#allocation20 + $0xe8] sm:$0xff] }
 0x93d   : > { %1852 = vmatpush.msra.mxu3 %v879_v6 }
 0x93e   : > { %1726 = vadd.xlane.f32.xlu1 %v1724_v7 }
 0x9b1   : > { %v1727_v8 = vpop.xlane.xlu1 %1726 }
 0x9b2   : > { %v1728_v9 = vrot.slane %v1727_v8, 4 }
 0x9b4   : > { %v1729_v10 = vadd.f32 %v1728_v9, %v1727_v8  ;;  %v878_v8 = vld [vmem:[#allocation20 + $0xe0] sm:$0xff]  ;;  %v861_v9 = vld [vmem:[#allocation20 + $0x58] sm:$0xff] }
 0x9b5   : > { %1853 = vmatpush.msra.mxu3 %v878_v8 }
 0x9b6   : > { %v1730_v11 = vrot.slane %v1729_v10, 2 }
 0x9b8   : > { %v1731_v12 = vadd.f32 %v1730_v11, %v1729_v10  ;;  %v877_v10 = vld [vmem:[#allocation20 + $0xd8] sm:$0xff]  ;;  %v860_v11 = vld [vmem:[#allocation20 + $0x50] sm:$0xff] }
 0x9b9   : > { %1854 = vmatpush.msra.mxu3 %v877_v10 }
 0x9ba   : > { %v1732_v13 = vrot.slane %v1731_v12, 1 }
 0x9bc   : > { %v1733_v14 = vadd.f32 %v1732_v13, %v1731_v12  ;;  %v876_v12 = vld [vmem:[#allocation20 + $0xd0] sm:$0xff]  ;;  %v859_v13 = vld [vmem:[#allocation20 + $0x48] sm:$0xff] }
 0x9bd   : > { %1855 = vmatpush.msra.mxu3 %v876_v12 }
 0x9be   : > { %2197 = vpush %v1733_v14  ;;  %v875_v14 = vld [vmem:[#allocation20 + $0xc8] sm:$0xff] }
 0x9bf   : > { %1856 = vmatpush.msra.mxu3 %v875_v14 }
 0x9ef   : > { %s2198_s5 = spop %2197 }
 0x9f0   : > { %s1743_s6 = smul.f32 %s2198_s5, %s3261_s14 }
 0x9f2   : > { %v1744_v15 = vstv %s1743_s6 }
 0x9f3   : > { %v3316_v16 = vsub.f32 %v1724_v7, %v1744_v15  ;;  %v862_v7 = vld [vmem:[#allocation20 + $0x60] sm:$0xff] }
 0x9f4   : > { %1833 = vmatpush.msra.mxu2 %v862_v7  ;;  %v858_v15 = vld [vmem:[#allocation20 + $0x40] sm:$0xff] }
 0x9f5   : > { %v1746_v17 = vmul.f32 %v3316_v16, %v3316_v16 }
 0x9f6   : > { %1834 = vmatpush.msra.mxu2 %v861_v9 }
 0x9f7   : > { %1747 = vadd.xlane.f32.xlu0 %v1746_v17  ;;  %v874_v17 = vld [vmem:[#allocation20 + $0xc0] sm:$0xff] }
 0x9f8   : > { %1835 = vmatpush.msra.mxu2 %v860_v11  ;;  %1857 = vmatpush.msra.mxu3 %v874_v17 }
 0x9fa   : > { %1836 = vmatpush.msra.mxu2 %v859_v13 }
 0x9fc   : > { %1837 = vmatpush.msra.mxu2 %v858_v15 }
 0xa6a   : > { %v1748_v18 = vpop.xlane.xlu0 %1747 }
 0xa6b   : > { %v1749_v56 = vrot.slane %v1748_v18, 4 }
 0xa6d   : > { %v1750_v19 = vadd.f32 %v1749_v56, %v1748_v18  ;;  %v857_v18 = vld [vmem:[#allocation20 + $0x38] sm:$0xff] }
 0xa6e   : > { %v873_v56 = vld [vmem:[#allocation20 + $0xb8] sm:$0xff]  ;;  %1838 = vmatpush.msra.mxu2 %v857_v18 }
 0xa6f   : > { %v1751_v20 = vrot.slane %v1750_v19, 2  ;;  %1858 = vmatpush.msra.mxu3 %v873_v56 }
 0xa71   : > { %v1752_v21 = vadd.f32 %v1751_v20, %v1750_v19  ;;  %v856_v19 = vld [vmem:[#allocation20 + $0x30] sm:$0xff] }
 0xa72   : > { %v872_v20 = vld [vmem:[#allocation20 + $0xb0] sm:$0xff]  ;;  %1839 = vmatpush.msra.mxu2 %v856_v19 }
 0xa73   : > { %v1753_v22 = vrot.slane %v1752_v21, 1  ;;  %1859 = vmatpush.msra.mxu3 %v872_v20 }
 0xa75   : > { %v1754_v23 = vadd.f32 %v1753_v22, %v1752_v21  ;;  %v855_v21 = vld [vmem:[#allocation20 + $0x28] sm:$0xff] }
 0xa76   : > { %v871_v22 = vld [vmem:[#allocation20 + $0xa8] sm:$0xff]  ;;  %1840 = vmatpush.msra.mxu2 %v855_v21 }
 0xa77   : > { %2199 = vpush %v1754_v23  ;;  %v854_v23 = vld [vmem:[#allocation20 + $0x20] sm:$0xff]  ;;  %1860 = vmatpush.msra.mxu3 %v871_v22 }
 0xa78   : > { %1841 = vmatpush.msra.mxu2 %v854_v23 }
 0xa79   : > { %1861 = vmatpush.msra.mxu3 %v870_v24 }
 0xa7a   : > { %1842 = vmatpush.msra.mxu2 %v853_v25 }
 0xa7b   : > { %1862 = vmatpush.msra.mxu3 %v869_v57 }
 0xa7c   : > { %1843 = vmatpush.msra.mxu2 %v852_v27 }
 0xa7d   : > { %1863 = vmatpush.msra.mxu3 %v868_v28 }
 0xa7e   : > { %1844 = vmatpush.msra.mxu2 %v851_v29 }
 0xa7f   : > { %1864 = vmatpush.msra.mxu3 %v867_v30 }
 0xa80   : > { %1845 = vmatpush.msra.mxu2 %v850_v31 }
 0xa81   : > { %1865 = vmatpush.msra.mxu3 %v866_v32 }
 0xaa8   : > { %s2200_s10 = spop %2199 }
 0xaa9   : > { %s1764_s17 = smul.f32 %s2200_s10, %s3261_s14 }
 0xaab   : > { %s1765_s28 = sadd.f32 1e-05, %s1764_s17  ;;  %s688_s17 = scalar_lea.vmem [#allocation22], %s3159_s9 }
 0xaad   : > { %v1766_v38 = vstv %s1765_s28  ;;  %s1939_s28 = sshll.u32 %s688_s17, 4  ;;  %s1940_s28 = int_to_ptr.vmem [resolvable:$true] %s1939_s28 }
 0xaae   : > { %2406 = vrsqrt.f32 %v1766_v38  ;;  %vm1773_vm10 = vweird.f32 %v1766_v38 }
 0xab4   : > { %v2407_v45 = vpop.eup %2406 }
 0xab5   : > { %v1768_v49 = vmul.f32 %v2407_v45, %v1766_v38  ;;  %vm1774_vm9 = vweird.f32 %v2407_v45 }
 0xab6   : > { %vm1775_vm11 = vmor %vm1773_vm10, %vm1774_vm9 }
 0xab7   : > { %v1769_v52 = vmul.f32 %v2407_v45, %v1768_v49 }
 0xab9   : > { %v1770_v55 = vmul.f32 0.5, %v1769_v52 }
 0xabb   : > { %v1771_v59 = vsub.f32 1.5, %v1770_v55 }
 0xabd   : > { %v1772_v60 = vmul.f32 %v2407_v45, %v1771_v59 }
 0xabf   : > { %v1776_v61 = vsel %vm1775_vm11, %v2407_v45, %v1772_v60 }
 0xac0   : > { %2201 = vpush %v1776_v61 }
 0xaf1   : > { %s2202_s4 = spop %2201 }
 0xaf2   : > { %v1778_v58 = vstv %s2202_s4 }
 0xaf3   : > { %v1779_v26 = vmul.f32 %v1778_v58, %v3316_v16  ;;  %v1782_v16 = vperm.slane %v849_v33, 1 }
 0xaf5   : > { %1801 = vmatmul.f32.vlgmr.msra.gmra.mxu0 %v1779_v26  ;;  %1821 = vmatmul.f32.vlgmr.msra.gmra.mxu1 %v1779_v26 }
 0xb72   : > { %v1802_v35 = vpop.f32.mrf.mxu0  ;;  %v1822_v36 = vpop.f32.mrf.mxu1 }
 0xb73   : > { %v1803_v37 = vadd.f32 %v1802_v35, %v1781_v34  ;;  %v1823_v38 = vadd.f32 %v1822_v36, %v1782_v16 }
 0xb75   : > { %v1825_v39 = vmax.f32 %v1803_v37, 0.0  ;;  %v1826_v40 = vmax.f32 %v1823_v38, 0.0 }
 0xb77   : > { %1846 = vmatmul.f32.vlgmr.msra.gmra.mxu2 %v1825_v39  ;;  %1866 = vmatmul.f32.vlgmr.msra.gmra.mxu3 %v1826_v40 }
 0xbfa   : > { %v1847_v42 = vpop.f32.mrf.mxu2  ;;  %v1867_v44 = vpop.f32.mrf.mxu3 }
 0xbfb   : > { %v1848_v43 = vadd.f32 %v2369_v41, %v1847_v42 }
 0xbfd   : > { %v1868_v45 = vadd.f32 %v1867_v44, %v1848_v43 }
 0xbff   : > { %v1870_v46 = vadd.f32 %v1868_v45, %v1779_v26 }
 0xc01   : > { %1871 = vadd.xlane.f32.xlu2 %v1870_v46 }
 0xc74   : > { %v1872_v48 = vpop.xlane.xlu2 %1871 }
 0xc75   : > { %v1873_v49 = vrot.slane %v1872_v48, 4 }
 0xc77   : > { %v1874_v50 = vadd.f32 %v1873_v49, %v1872_v48 }
 0xc79   : > { %v1875_v51 = vrot.slane %v1874_v50, 2 }
 0xc7b   : > { %v1876_v52 = vadd.f32 %v1875_v51, %v1874_v50 }
 0xc7d   : > { %v1877_v53 = vrot.slane %v1876_v52, 1 }
 0xc7f   : > { %v1878_v54 = vadd.f32 %v1877_v53, %v1876_v52 }
 0xc81   : > { %2203 = vpush %v1878_v54 }
 0xcb2   : > { %s2204_s7 = spop %2203 }
 0xcb3   : > { %s1888_s2 = smul.f32 %s2204_s7, %s3261_s14 }
 0xcb5   : > { %v1889_v55 = vstv %s1888_s2 }
 0xcb6   : > { %v1890_v59 = vsub.f32 %v1870_v46, %v1889_v55 }
 0xcb8   : > { %v1891_v60 = vmul.f32 %v1890_v59, %v1890_v59 }
 0xcba   : > { %1892 = vadd.xlane.f32.xlu1 %v1891_v60 }
 0xd2d   : > { %v1893_v61 = vpop.xlane.xlu1 %1892 }
 0xd2e   : > { %v1894_v62 = vrot.slane %v1893_v61, 4 }
 0xd30   : > { %v1895_v63 = vadd.f32 %v1894_v62, %v1893_v61 }
 0xd32   : > { %v1896_v0 = vrot.slane %v1895_v63, 2 }
 0xd34   : > { %v1897_v1 = vadd.f32 %v1896_v0, %v1895_v63 }
 0xd36   : > { %v1898_v2 = vrot.slane %v1897_v1, 1 }
 0xd38   : > { %v1899_v3 = vadd.f32 %v1898_v2, %v1897_v1 }
 0xd3a   : > { %2205 = vpush %v1899_v3 }
 0xd6b   : > { %s2206_s27 = spop %2205 }
 0xd6c   : > { %s1909_s3 = smul.f32 %s2206_s27, %s3261_s14  ;;  %s3411_s14 = sld [smem:[#allocation44_spill]] }
 0xd6e   : > { %s1910_s18 = sadd.f32 1e-05, %s1909_s3 }
 0xd70   : > { %v1911_v4 = vstv %s1910_s18 }
 0xd71   : > { %2408 = vrsqrt.f32 %v1911_v4  ;;  %vm1918_vm13 = vweird.f32 %v1911_v4 }
 0xd72   : > { %s1937_s10 = scalar_lea.hbm %s3411_s14, %s2186_s24  ;;  %s2790_s9 = scalar_lea.hbm %s3411_s14, 16 }
 0xd73   : > { %s1941_s4 = sshll.u32 %s1937_s10, 4  ;;  %s1942_s4 = int_to_ptr.hbm [resolvable:$true] %s1941_s4 }
 0xd74   : > { %s2784_s13 = sshra.s32 %s1942_s4, 4  ;;  %s2785_s13 = int_to_ptr.hbm [resolvable:$true] %s2784_s13 }
 0xd75   : > { %s2786_s22 = scalar_lea.hbm %s2785_s13, 8  ;;  %p2791_p7 = scmp.lt.s32.totalorder %s2785_s13, %s3411_s14 }
 0xd76   : > { %p2787_p1 = scmp.ne.s32.totalorder %s2785_s13, %s2786_s22  ;;  %p2792_p9 = scmp.lt.s32.totalorder %s2790_s9, %s2786_s22 }
 0xd77   : > { %v2409_v5 = vpop.eup %2408 }
 0xd78   : > { %v1913_v47 = vmul.f32 %v2409_v5, %v1911_v4  ;;  %vm1919_vm12 = vweird.f32 %v2409_v5  ;;  %p2788_p3 = pnand %p2787_p1, %p3103_p4  ;;  %p2793_p8 = por %p2792_p9, %p2791_p7 }
 0xd79   : > { %vm1920_vm14 = vmor %vm1918_vm13, %vm1919_vm12 }
 0xd7a   : > { %v1914_v6 = vmul.f32 %v2409_v5, %v1913_v47  ;;  %p2789_p12 = pneg %p2788_p3 }
 0xd7c   : > { %v1915_v7 = vmul.f32 0.5, %v1914_v6  ;;  %p2794_p10 = pnand %p2793_p8, %p2789_p12 }
 0xd7e   : > { %v1916_v8 = vsub.f32 1.5, %v1915_v7 }
 0xd80   : > { %v1917_v9 = vmul.f32 %v2409_v5, %v1916_v8 }
 0xd82   : > { %v1921_v10 = vsel %vm1920_vm14, %v2409_v5, %v1917_v9 }
 0xd83   : > { %2207 = vpush %v1921_v10 }
 0xdb4   : > { %s2208_s12 = spop %2207 }
 0xdb5   : > { %v1923_v11 = vstv %s2208_s12 }
 0xdb6   : > { %v1924_v12 = vmul.f32 %v1923_v11, %v1890_v59 }
 0xdb8   : > { %1925 = vst [vmem:[%s688_s17] sm:$0xff] %v1924_v12 }
 0xdb9   : > { %2797 = shalt.err (!%p2794_p10)
}
 0xdba   : > { %2253 = dma.vmem_to_hbm [thread:$0]  (%p3103_p4), %s1940_s28, 128, %s1942_s4, %s1927_s21  }
 0xdbb PF: > { %s1953_s8 = sand.u32 1, %s2852_s29   ;;  %p3412_p11 = scmp.ge.s32.totalorder %s2864_s16, 2 }
 0xdbc   : > { %s1954_s27 = scalar_lea.sflag [#allocation4], %s1953_s8 }
 0xdbd   : > { %p2294_p5 = pnand %p3412_p11, %p3107_p6 }
 0xdbf   : > { %p2295_p13 = pneg %p2294_p5 }
 0xdc1   : > { %2847 = dma.done.wait (%p2295_p13), %s1954_s27, 128  }
 0xdc2   : > { %2849 = vsyncadd (%p2295_p13), %s1954_s27, 4294967168  ;;  %s3413_s3 = sld [smem:[#allocation32_spill]]  ;;  %p35_p0 = scmp.ge.s32.totalorder %s3077_s19, 4  }
 0xdc3   : > { %s3414_s29 = smov %s2856_s30  ;;  %s3415_s30 = smov %s2860_s15 }
 0xdc4   : > { %s3417_s16 = smov %s3077_s19  ;;  %37 = sbr.rel (!%p35_p0) target bundleno = 25 (0x19), region = 174 }
 0xdc8   : > { %s3416_s15 = smov %s3413_s3 }
 0xdc9   :  { %1960 = vsyncpa [#allocation3], 1 }
 0xdca   :  { %1962 = vsyncpa [#allocation3 + $0x1], 1 }
 0xdcb   :  { %1963 = vsyncpa [#allocation6], 1 }
 0xdcc   :  { %1965 = vsyncpa [#allocation6 + $0x1], 1 }
 0xdcd   :  { %1966 = vsyncpa [#allocation9], 1 }
 0xdce   :  { %1967 = vsyncpa [#allocation12], 1 }
 0xdcf   :  { %1968 = vsyncpa [#allocation15], 1 }
 0xdd0   :  { %1969 = vsyncpa [#allocation18], 1 }
 0xdd1   :  { %1970 = vsyncpa [#allocation21], 1 }
 0xdd2   :  { %1971 = vsyncpa [#allocation4], 1 }
 0xdd3   :  { %1973 = vsyncpa [#allocation4 + $0x1], 1 }

</bundles_post_ra>
